<compile_context>
chip_gen: v7x
topology: tpu7x:2x2x1
jax: 0.10.0
libtpu: 0.0.40
codegen_flags: <defaults>
</compile_context>

<pallas_src>
import functools

import jax
import jax.numpy as jnp
from jax.experimental import pallas as pl
from jax.experimental.pallas import tpu as pltpu

EPS = 1e-5  # nn.LayerNorm default


def _layernorm(x, gamma, beta):
    mean = jnp.mean(x, axis=-1, keepdims=True)
    var = jnp.mean((x - mean) ** 2, axis=-1, keepdims=True)
    return (x - mean) * jax.lax.rsqrt(var + EPS) * gamma + beta


def transformer_block_kernel(heads, head_dim, nb, seq, ff_chunk, n_ff_chunks,
                             compute_dtype, approx_recip,
                             x_ref, wqkv_ref, wo_ref, w1_ref, bf1_ref,
                             w2_ref, vecs_ref, o_ref):
    """One grid step == `nb` batch elements, flattened to (nb*seq, E)."""
    E = heads * head_dim
    BS = nb * seq

    xf = x_ref[...]                                   # (BS, E) f32, residual path
    xc = xf.astype(compute_dtype)                     # bf16 operand for the MXU

    # --- fused full-width Q/K/V projections (softmax scale folded into wqkv[0]) ---
    q = jnp.dot(xc, wqkv_ref[0], preferred_element_type=jnp.float32)   # (BS, E)
    k = jnp.dot(xc, wqkv_ref[1], preferred_element_type=jnp.float32)
    v = jnp.dot(xc, wqkv_ref[2], preferred_element_type=jnp.float32)
    q3 = q.reshape(nb, seq, E).astype(compute_dtype)
    k3 = k.reshape(nb, seq, E).astype(compute_dtype)
    v3 = v.reshape(nb, seq, E).astype(compute_dtype)

    # --- packed bias / LayerNorm vectors (f32) ---
    vecs = vecs_ref[...]                              # (8, E)
    bo, g1, b1 = vecs[0:1], vecs[1:2], vecs[2:3]
    bf2, g2, b2 = vecs[3:4], vecs[4:5], vecs[5:6]

    # --- per-head attention; fc_out partial products accumulated per head ---
    # (no jnp.concatenate of 16-lane head slices; only one (BS, E) accumulator live)
    attn = jnp.zeros((BS, E), jnp.float32)
    for h in range(heads):                            # heads is small & static
        lo = h * head_dim
        qh = q3[:, :, lo:lo + head_dim]               # (nb, S, hd) bf16
        kh = k3[:, :, lo:lo + head_dim]
        vh = v3[:, :, lo:lo + head_dim]
        e = jnp.einsum("nqd,nkd->nqk", qh, kh,
                       preferred_element_type=jnp.float32)   # (nb, S, S) f32
        e = e - jnp.max(e, axis=-1, keepdims=True)
        p = jnp.exp(e)
        denom = jnp.sum(p, axis=-1, keepdims=True)
        p = p * pl.reciprocal(denom, approx=approx_recip)    # EUP slot when approx
        ctx_h = jnp.einsum("nqk,nkd->nqd", p.astype(compute_dtype), vh,
                           preferred_element_type=jnp.float32)  # (nb, S, hd)
        attn = attn + jnp.dot(ctx_h.reshape(BS, head_dim).astype(compute_dtype),
                              wo_ref[lo:lo + head_dim, :],
                              preferred_element_type=jnp.float32)
    attn = attn + bo

    # --- residual + LayerNorm 1 (f32) ---
    h1 = _layernorm(attn + xf, g1, b1)
    h1c = h1.astype(compute_dtype)

    # --- feed-forward, chunked over the hidden dim (bounds the ReLU intermediate) ---
    ff = jnp.zeros((BS, E), jnp.float32)
    for c in range(n_ff_chunks):
        lo = c * ff_chunk
        a = jnp.dot(h1c, w1_ref[:, lo:lo + ff_chunk],
                    preferred_element_type=jnp.float32)          # (BS, chunk)
        a = jnp.maximum(a + bf1_ref[:, lo:lo + ff_chunk], 0.0)
        ff = ff + jnp.dot(a.astype(compute_dtype), w2_ref[lo:lo + ff_chunk, :],
                          preferred_element_type=jnp.float32)
    ff = ff + bf2

    # --- residual + LayerNorm 2 (dropout = identity in eval mode) ---
    o_ref[...] = _layernorm(ff + h1, g2, b2)


def _choose_batch_block(N, S, target_rows=512):
    """Largest divisor nb of N with nb*S <= target_rows (multiple of 8 unless full),
    preferring >= 2 grid steps so both v7x TensorCores get work."""
    candidates = [d for d in range(1, N + 1)
                  if N % d == 0 and (d == N or (d * S) % 8 == 0)]
    fitting = [d for d in candidates if d * S <= target_rows]
    multi_step = [d for d in fitting if N // d >= 2]
    if multi_step:
        return max(multi_step)
    if fitting:
        return max(fitting)
    return min(candidates)


def _choose_ff_chunk(hidden, target=1024):
    if hidden <= target:
        return hidden
    for c in range(target, 127, -1):
        if hidden % c == 0 and c % 128 == 0:
            return c
    for c in range(target, 0, -1):
        if hidden % c == 0:
            return c
    return hidden


def transformer_block(x, params, heads, batch_block=None, ff_chunk=None,
                      compute_dtype=jnp.bfloat16, approx_recip=True):
    N, S, E = x.shape
    head_dim = E // heads
    hidden = params["w1"].shape[0]

    if batch_block is None:
        batch_block = _choose_batch_block(N, S)
    assert N % batch_block == 0
    NB = batch_block
    BS = NB * S
    if ff_chunk is None:
        ff_chunk = _choose_ff_chunk(hidden)
    assert hidden % ff_chunk == 0
    n_ff_chunks = hidden // ff_chunk

    # --- one-time weight preprocessing (plain XLA, outside the kernel) ---
    scale = 1.0 / jnp.sqrt(jnp.float32(E))
    eye_h = jnp.eye(heads, dtype=jnp.float32)
    wq_bd = jnp.kron(eye_h, params["wq"].T) * scale   # (E, E) block-diag, scale folded
    wk_bd = jnp.kron(eye_h, params["wk"].T)
    wv_bd = jnp.kron(eye_h, params["wv"].T)
    wqkv = jnp.stack([wq_bd, wk_bd, wv_bd]).astype(compute_dtype)   # (3, E, E) bf16
    wo_t = params["wo"].T.astype(compute_dtype)                      # (E, E)
    w1_t = params["w1"].T.astype(compute_dtype)                      # (E, hidden)
    w2_t = params["w2"].T.astype(compute_dtype)                      # (hidden, E)
    bf1 = params["bf1"]                                              # (1, hidden) f32
    vecs = jnp.concatenate(
        [params["bo"], params["g1"], params["b1"],
         params["bf2"], params["g2"], params["b2"],
         jnp.zeros((2, E), jnp.float32)], axis=0)                    # (8, E) f32

    x2 = x.reshape(N * S, E)

    kernel = functools.partial(transformer_block_kernel, heads, head_dim, NB, S,
                               ff_chunk, n_ff_chunks, compute_dtype, approx_recip)

    # VMEM budget estimate: single-buffered bf16 weights + double-buffered f32
    # activation tiles + in-kernel temporaries, clamped to [32 MiB, 48 MiB]
    # (48 MiB leaves headroom under v7x's 64 MiB physical VMEM).
    weight_bytes = (3 * E * E + E * E + 2 * E * hidden) * jnp.dtype(compute_dtype).itemsize
    act_bytes = 2 * 2 * BS * E * 4
    temp_bytes = BS * (6 * E + ff_chunk) * 4
    vmem_limit = int(max(32 << 20, min(weight_bytes + act_bytes + temp_bytes + (8 << 20),
                                       48 << 20)))

    def _build(single_buffer_weights):
        if single_buffer_weights:
            # Grid-invariant weights: no point double-buffering a constant block.
            def wspec(shape):
                return pl.BlockSpec(shape, lambda i: (0,) * len(shape),
                                    pipeline_mode=pl.Buffered(1))
        else:
            def wspec(shape):
                return pl.BlockSpec(shape, lambda i: (0,) * len(shape))
        return pl.pallas_call(
            kernel,
            out_shape=jax.ShapeDtypeStruct((N * S, E), jnp.float32),
            grid_spec=pltpu.PrefetchScalarGridSpec(
                num_scalar_prefetch=0,
                grid=(N // NB,),
                in_specs=[
                    pl.BlockSpec((BS, E), lambda i: (i, 0)),   # x (flattened batch*seq)
                    wspec((3, E, E)),                          # fused QKV weights (bf16)
                    wspec((E, E)),                             # wo (pre-T, bf16)
                    wspec((E, hidden)),                        # fc1 weight (pre-T, bf16)
                    wspec((1, hidden)),                        # fc1 bias (f32)
                    wspec((hidden, E)),                        # fc2 weight (pre-T, bf16)
                    wspec((8, E)),                             # packed biases/ln vecs (f32)
                ],
                out_specs=pl.BlockSpec((BS, E), lambda i: (i, 0)),
            ),
            compiler_params=pltpu.CompilerParams(
                dimension_semantics=("parallel",),
                vmem_limit_bytes=vmem_limit),
        )

    args = (x2, wqkv, wo_t, w1_t, bf1, w2_t, vecs)
    try:
        out2 = _build(True)(*args)
    except Exception:
        # Fallback: this jax build rejected pipeline_mode=pl.Buffered(1) at the
        # pallas_call level; default double-buffering is still correct, just uses
        # more VMEM for the constant weight blocks.
        out2 = _build(False)(*args)

    return out2.reshape(N, S, E)


def reference(x, params, heads):
    """Pure-JAX reference mirroring the PyTorch forward (eval mode)."""
    N, S, E = x.shape
    hd = E // heads
    xh = x.reshape(N, S, heads, hd)
    q = jnp.einsum("nshd,fd->nshf", xh, params["wq"])
    k = jnp.einsum("nshd,fd->nshf", xh, params["wk"])
    v = jnp.einsum("nshd,fd->nshf", xh, params["wv"])
    energy = jnp.einsum("nqhd,nkhd->nhqk", q, k) / jnp.sqrt(jnp.float32(E))
    attn = jax.nn.softmax(energy, axis=3)
    out = jnp.einsum("nhqk,nkhd->nqhd", attn, v).reshape(N, S, E)
    out = out @ params["wo"].T + params["bo"][0]
    h1 = _layernorm(out + x, params["g1"][0], params["b1"][0])
    ff = jax.nn.relu(h1 @ params["w1"].T + params["bf1"][0])
    ff = ff @ params["w2"].T + params["bf2"][0]
    return _layernorm(ff + h1, params["g2"][0], params["b2"][0])


def init_params(key, embed_size, heads, forward_expansion):
    head_dim = embed_size // heads
    hidden = forward_expansion * embed_size
    ks = jax.random.split(key, 8)
    s = 0.05
    return {
        "wq": s * jax.random.normal(ks[0], (head_dim, head_dim), jnp.float32),
        "wk": s * jax.random.normal(ks[1], (head_dim, head_dim), jnp.float32),
        "wv": s * jax.random.normal(ks[2], (head_dim, head_dim), jnp.float32),
        "wo": s * jax.random.normal(ks[3], (embed_size, embed_size), jnp.float32),
        "bo": s * jax.random.normal(ks[4], (1, embed_size), jnp.float32),
        "g1": jnp.ones((1, embed_size), jnp.float32),
        "b1": jnp.zeros((1, embed_size), jnp.float32),
        "w1": s * jax.random.normal(ks[5], (hidden, embed_size), jnp.float32),
        "bf1": s * jax.random.normal(ks[6], (1, hidden), jnp.float32),
        "w2": s * jax.random.normal(ks[7], (embed_size, hidden), jnp.float32),
        "bf2": jnp.zeros((1, embed_size), jnp.float32),
        "g2": jnp.ones((1, embed_size), jnp.float32),
        "b2": jnp.zeros((1, embed_size), jnp.float32),
    }


if __name__ == "__main__":
    # small shapes consistent with the module: embed_size=64, heads=4
    N, S, E = 2, 8, 64
    HEADS = 4
    FORWARD_EXPANSION = 4

    root = jax.random.PRNGKey(0)
    k_x, k_p = jax.random.split(root)
    x = jax.random.normal(k_x, (N, S, E), jnp.float32)
    params = init_params(k_p, E, HEADS, FORWARD_EXPANSION)

    out = transformer_block(x, params, HEADS)
    out = jax.block_until_ready(out)

    ref = reference(x, params, HEADS)
    assert out.shape == (N, S, E)
    assert jnp.all(jnp.isfinite(out))
    # loose tolerance: bf16 MXU operands + approx reciprocal vs XLA default precision
    assert jnp.max(jnp.abs(out - ref)) < 5e-2, float(jnp.max(jnp.abs(out - ref)))

    print("KERNEL_OK")
</pallas_src>

<mosaic_0001>
module attributes {stable_mosaic.version = 11 : i64} {
  func.func @transformer_block_kernel(%arg0: i32, %arg1: memref<8x64xf32, #tpu.memory_space<vmem>>, %arg2: memref<3x64x64xbf16, #tpu.memory_space<vmem>>, %arg3: memref<64x64xbf16, #tpu.memory_space<vmem>>, %arg4: memref<64x256xbf16, #tpu.memory_space<vmem>>, %arg5: memref<1x256xf32, #tpu.memory_space<vmem>>, %arg6: memref<256x64xbf16, #tpu.memory_space<vmem>>, %arg7: memref<8x64xf32, #tpu.memory_space<vmem>>, %arg8: memref<8x64xf32, #tpu.memory_space<vmem>>) attributes {dimension_semantics = [#tpu.dimension_semantics<parallel>], iteration_bounds = array<i64: 2>, scalar_prefetch = 0 : i64, scratch_operands = 0 : i64, tpu.core_type = #tpu.core_type<tc>, window_params = [{transform_indices = @transform_0, window_bounds = array<i64: 8, 64>}, {pipeline_mode = #tpu.pipeline_mode<synchronous>, transform_indices = @transform_1, window_bounds = array<i64: 3, 64, 64>}, {pipeline_mode = #tpu.pipeline_mode<synchronous>, transform_indices = @transform_2, window_bounds = array<i64: 64, 64>}, {pipeline_mode = #tpu.pipeline_mode<synchronous>, transform_indices = @transform_3, window_bounds = array<i64: 64, 256>}, {pipeline_mode = #tpu.pipeline_mode<synchronous>, transform_indices = @transform_4, window_bounds = array<i64: 1, 256>}, {pipeline_mode = #tpu.pipeline_mode<synchronous>, transform_indices = @transform_5, window_bounds = array<i64: 256, 64>}, {pipeline_mode = #tpu.pipeline_mode<synchronous>, transform_indices = @transform_6, window_bounds = array<i64: 8, 64>}, {transform_indices = @transform_7, window_bounds = array<i64: 8, 64>}]} {
    %c0 = arith.constant 0 : index
    %c0_0 = arith.constant 0 : index
    %0 = vector.load %arg1[%c0, %c0_0] : memref<8x64xf32, #tpu.memory_space<vmem>>, vector<8x64xf32>
    %1 = arith.truncf %0 : vector<8x64xf32> to vector<8x64xbf16>
    %c0_1 = arith.constant 0 : index
    %c0_2 = arith.constant 0 : index
    %c0_3 = arith.constant 0 : index
    %2 = vector.load %arg2[%c0_1, %c0_2, %c0_3] : memref<3x64x64xbf16, #tpu.memory_space<vmem>>, vector<1x64x64xbf16>
    %3 = vector.shape_cast %2 : vector<1x64x64xbf16> to vector<64x64xbf16>
    %cst = arith.constant dense<0.000000e+00> : vector<8x64xf32>
    %4 = tpu.matmul %1, %3, %cst {dimension_numbers = #tpu.dot_dimension_numbers<[1], [0], [0], [1], [0, 0, 1, 1], [], []>} : vector<8x64xbf16>, vector<64x64xbf16>, vector<8x64xf32> -> vector<8x64xf32>
    %c1 = arith.constant 1 : index
    %c0_4 = arith.constant 0 : index
    %c0_5 = arith.constant 0 : index
    %5 = vector.load %arg2[%c1, %c0_4, %c0_5] : memref<3x64x64xbf16, #tpu.memory_space<vmem>>, vector<1x64x64xbf16>
    %6 = vector.shape_cast %5 : vector<1x64x64xbf16> to vector<64x64xbf16>
    %cst_6 = arith.constant dense<0.000000e+00> : vector<8x64xf32>
    %7 = tpu.matmul %1, %6, %cst_6 {dimension_numbers = #tpu.dot_dimension_numbers<[1], [0], [0], [1], [0, 0, 1, 1], [], []>} : vector<8x64xbf16>, vector<64x64xbf16>, vector<8x64xf32> -> vector<8x64xf32>
    %c2 = arith.constant 2 : index
    %c0_7 = arith.constant 0 : index
    %c0_8 = arith.constant 0 : index
    %8 = vector.load %arg2[%c2, %c0_7, %c0_8] : memref<3x64x64xbf16, #tpu.memory_space<vmem>>, vector<1x64x64xbf16>
    %9 = vector.shape_cast %8 : vector<1x64x64xbf16> to vector<64x64xbf16>
    %cst_9 = arith.constant dense<0.000000e+00> : vector<8x64xf32>
    %10 = tpu.matmul %1, %9, %cst_9 {dimension_numbers = #tpu.dot_dimension_numbers<[1], [0], [0], [1], [0, 0, 1, 1], [], []>} : vector<8x64xbf16>, vector<64x64xbf16>, vector<8x64xf32> -> vector<8x64xf32>
    %11 = vector.shape_cast %4 : vector<8x64xf32> to vector<1x8x64xf32>
    %12 = arith.truncf %11 : vector<1x8x64xf32> to vector<1x8x64xbf16>
    %13 = vector.shape_cast %7 : vector<8x64xf32> to vector<1x8x64xf32>
    %14 = arith.truncf %13 : vector<1x8x64xf32> to vector<1x8x64xbf16>
    %15 = vector.shape_cast %10 : vector<8x64xf32> to vector<1x8x64xf32>
    %16 = arith.truncf %15 : vector<1x8x64xf32> to vector<1x8x64xbf16>
    %c0_10 = arith.constant 0 : index
    %c0_11 = arith.constant 0 : index
    %17 = vector.load %arg7[%c0_10, %c0_11] : memref<8x64xf32, #tpu.memory_space<vmem>>, vector<8x64xf32>
    %18 = vector.extract_strided_slice %17 {offsets = [0, 0], sizes = [1, 64], strides = [1, 1]} : vector<8x64xf32> to vector<1x64xf32>
    %19 = vector.extract_strided_slice %17 {offsets = [1, 0], sizes = [1, 64], strides = [1, 1]} : vector<8x64xf32> to vector<1x64xf32>
    %20 = vector.extract_strided_slice %17 {offsets = [2, 0], sizes = [1, 64], strides = [1, 1]} : vector<8x64xf32> to vector<1x64xf32>
    %21 = vector.extract_strided_slice %17 {offsets = [3, 0], sizes = [1, 64], strides = [1, 1]} : vector<8x64xf32> to vector<1x64xf32>
    %22 = vector.extract_strided_slice %17 {offsets = [4, 0], sizes = [1, 64], strides = [1, 1]} : vector<8x64xf32> to vector<1x64xf32>
    %23 = vector.extract_strided_slice %17 {offsets = [5, 0], sizes = [1, 64], strides = [1, 1]} : vector<8x64xf32> to vector<1x64xf32>
    %cst_12 = arith.constant 0.000000e+00 : f32
    %24 = vector.broadcast %cst_12 : f32 to vector<8x64xf32>
    %25 = vector.extract_strided_slice %12 {offsets = [0, 0, 0], sizes = [1, 8, 16], strides = [1, 1, 1]} : vector<1x8x64xbf16> to vector<1x8x16xbf16>
    %26 = vector.extract_strided_slice %14 {offsets = [0, 0, 0], sizes = [1, 8, 16], strides = [1, 1, 1]} : vector<1x8x64xbf16> to vector<1x8x16xbf16>
    %27 = vector.extract_strided_slice %16 {offsets = [0, 0, 0], sizes = [1, 8, 16], strides = [1, 1, 1]} : vector<1x8x64xbf16> to vector<1x8x16xbf16>
    "tpu.trace_start"() <{level = 10 : i32, message = "nqd,nkd->nqk"}> : () -> ()
    %cst_13 = arith.constant dense<0.000000e+00> : vector<1x8x8xf32>
    %28 = tpu.matmul %25, %26, %cst_13 {dimension_numbers = #tpu.dot_dimension_numbers<[2], [2], [1], [1], [0, 0, 0, 1, 1, 1], [0], [0]>} : vector<1x8x16xbf16>, vector<1x8x16xbf16>, vector<1x8x8xf32> -> vector<1x8x8xf32>
    "tpu.trace_stop"() : () -> ()
    %cst_14 = arith.constant dense<0xFF800000> : vector<1x8xf32>
    %29 = vector.multi_reduction <maximumf>, %28, %cst_14 [2] : vector<1x8x8xf32> to vector<1x8xf32>
    %30 = vector.shape_cast %29 : vector<1x8xf32> to vector<1x8x1xf32>
    %31 = vector.broadcast %30 : vector<1x8x1xf32> to vector<1x8x8xf32>
    %32 = arith.subf %28, %31 : vector<1x8x8xf32>
    %33 = math.exp %32 : vector<1x8x8xf32>
    %cst_15 = arith.constant dense<0.000000e+00> : vector<1x8xf32>
    %34 = vector.multi_reduction <add>, %33, %cst_15 [2] : vector<1x8x8xf32> to vector<1x8xf32>
    %35 = vector.shape_cast %34 : vector<1x8xf32> to vector<1x8x1xf32>
    %36 = tpu.reciprocal %35 {approx = true} : vector<1x8x1xf32> -> vector<1x8x1xf32>
    %37 = vector.broadcast %36 : vector<1x8x1xf32> to vector<1x8x8xf32>
    %38 = arith.mulf %33, %37 : vector<1x8x8xf32>
    %39 = arith.truncf %38 : vector<1x8x8xf32> to vector<1x8x8xbf16>
    "tpu.trace_start"() <{level = 10 : i32, message = "nqk,nkd->nqd"}> : () -> ()
    %cst_16 = arith.constant dense<0.000000e+00> : vector<1x8x16xf32>
    %40 = tpu.matmul %39, %27, %cst_16 {dimension_numbers = #tpu.dot_dimension_numbers<[2], [1], [1], [2], [0, 0, 0, 1, 1, 2], [0], [0]>} : vector<1x8x8xbf16>, vector<1x8x16xbf16>, vector<1x8x16xf32> -> vector<1x8x16xf32>
    "tpu.trace_stop"() : () -> ()
    %41 = vector.shape_cast %40 : vector<1x8x16xf32> to vector<8x16xf32>
    %42 = arith.truncf %41 : vector<8x16xf32> to vector<8x16xbf16>
    %c0_17 = arith.constant 0 : index
    %c0_18 = arith.constant 0 : index
    %43 = vector.load %arg3[%c0_17, %c0_18] : memref<64x64xbf16, #tpu.memory_space<vmem>>, vector<16x64xbf16>
    %cst_19 = arith.constant dense<0.000000e+00> : vector<8x64xf32>
    %44 = tpu.matmul %42, %43, %cst_19 {dimension_numbers = #tpu.dot_dimension_numbers<[1], [0], [0], [1], [0, 0, 1, 1], [], []>} : vector<8x16xbf16>, vector<16x64xbf16>, vector<8x64xf32> -> vector<8x64xf32>
    %45 = arith.addf %24, %44 : vector<8x64xf32>
    %46 = vector.extract_strided_slice %12 {offsets = [0, 0, 16], sizes = [1, 8, 16], strides = [1, 1, 1]} : vector<1x8x64xbf16> to vector<1x8x16xbf16>
    %47 = vector.extract_strided_slice %14 {offsets = [0, 0, 16], sizes = [1, 8, 16], strides = [1, 1, 1]} : vector<1x8x64xbf16> to vector<1x8x16xbf16>
    %48 = vector.extract_strided_slice %16 {offsets = [0, 0, 16], sizes = [1, 8, 16], strides = [1, 1, 1]} : vector<1x8x64xbf16> to vector<1x8x16xbf16>
    "tpu.trace_start"() <{level = 10 : i32, message = "nqd,nkd->nqk"}> : () -> ()
    %cst_20 = arith.constant dense<0.000000e+00> : vector<1x8x8xf32>
    %49 = tpu.matmul %46, %47, %cst_20 {dimension_numbers = #tpu.dot_dimension_numbers<[2], [2], [1], [1], [0, 0, 0, 1, 1, 1], [0], [0]>} : vector<1x8x16xbf16>, vector<1x8x16xbf16>, vector<1x8x8xf32> -> vector<1x8x8xf32>
    "tpu.trace_stop"() : () -> ()
    %cst_21 = arith.constant dense<0xFF800000> : vector<1x8xf32>
    %50 = vector.multi_reduction <maximumf>, %49, %cst_21 [2] : vector<1x8x8xf32> to vector<1x8xf32>
    %51 = vector.shape_cast %50 : vector<1x8xf32> to vector<1x8x1xf32>
    %52 = vector.broadcast %51 : vector<1x8x1xf32> to vector<1x8x8xf32>
    %53 = arith.subf %49, %52 : vector<1x8x8xf32>
    %54 = math.exp %53 : vector<1x8x8xf32>
    %cst_22 = arith.constant dense<0.000000e+00> : vector<1x8xf32>
    %55 = vector.multi_reduction <add>, %54, %cst_22 [2] : vector<1x8x8xf32> to vector<1x8xf32>
    %56 = vector.shape_cast %55 : vector<1x8xf32> to vector<1x8x1xf32>
    %57 = tpu.reciprocal %56 {approx = true} : vector<1x8x1xf32> -> vector<1x8x1xf32>
    %58 = vector.broadcast %57 : vector<1x8x1xf32> to vector<1x8x8xf32>
    %59 = arith.mulf %54, %58 : vector<1x8x8xf32>
    %60 = arith.truncf %59 : vector<1x8x8xf32> to vector<1x8x8xbf16>
    "tpu.trace_start"() <{level = 10 : i32, message = "nqk,nkd->nqd"}> : () -> ()
    %cst_23 = arith.constant dense<0.000000e+00> : vector<1x8x16xf32>
    %61 = tpu.matmul %60, %48, %cst_23 {dimension_numbers = #tpu.dot_dimension_numbers<[2], [1], [1], [2], [0, 0, 0, 1, 1, 2], [0], [0]>} : vector<1x8x8xbf16>, vector<1x8x16xbf16>, vector<1x8x16xf32> -> vector<1x8x16xf32>
    "tpu.trace_stop"() : () -> ()
    %62 = vector.shape_cast %61 : vector<1x8x16xf32> to vector<8x16xf32>
    %63 = arith.truncf %62 : vector<8x16xf32> to vector<8x16xbf16>
    %c16 = arith.constant 16 : index
    %c0_24 = arith.constant 0 : index
    %64 = vector.load %arg3[%c16, %c0_24] : memref<64x64xbf16, #tpu.memory_space<vmem>>, vector<16x64xbf16>
    %cst_25 = arith.constant dense<0.000000e+00> : vector<8x64xf32>
    %65 = tpu.matmul %63, %64, %cst_25 {dimension_numbers = #tpu.dot_dimension_numbers<[1], [0], [0], [1], [0, 0, 1, 1], [], []>} : vector<8x16xbf16>, vector<16x64xbf16>, vector<8x64xf32> -> vector<8x64xf32>
    %66 = arith.addf %45, %65 : vector<8x64xf32>
    %67 = vector.extract_strided_slice %12 {offsets = [0, 0, 32], sizes = [1, 8, 16], strides = [1, 1, 1]} : vector<1x8x64xbf16> to vector<1x8x16xbf16>
    %68 = vector.extract_strided_slice %14 {offsets = [0, 0, 32], sizes = [1, 8, 16], strides = [1, 1, 1]} : vector<1x8x64xbf16> to vector<1x8x16xbf16>
    %69 = vector.extract_strided_slice %16 {offsets = [0, 0, 32], sizes = [1, 8, 16], strides = [1, 1, 1]} : vector<1x8x64xbf16> to vector<1x8x16xbf16>
    "tpu.trace_start"() <{level = 10 : i32, message = "nqd,nkd->nqk"}> : () -> ()
    %cst_26 = arith.constant dense<0.000000e+00> : vector<1x8x8xf32>
    %70 = tpu.matmul %67, %68, %cst_26 {dimension_numbers = #tpu.dot_dimension_numbers<[2], [2], [1], [1], [0, 0, 0, 1, 1, 1], [0], [0]>} : vector<1x8x16xbf16>, vector<1x8x16xbf16>, vector<1x8x8xf32> -> vector<1x8x8xf32>
    "tpu.trace_stop"() : () -> ()
    %cst_27 = arith.constant dense<0xFF800000> : vector<1x8xf32>
    %71 = vector.multi_reduction <maximumf>, %70, %cst_27 [2] : vector<1x8x8xf32> to vector<1x8xf32>
    %72 = vector.shape_cast %71 : vector<1x8xf32> to vector<1x8x1xf32>
    %73 = vector.broadcast %72 : vector<1x8x1xf32> to vector<1x8x8xf32>
    %74 = arith.subf %70, %73 : vector<1x8x8xf32>
    %75 = math.exp %74 : vector<1x8x8xf32>
    %cst_28 = arith.constant dense<0.000000e+00> : vector<1x8xf32>
    %76 = vector.multi_reduction <add>, %75, %cst_28 [2] : vector<1x8x8xf32> to vector<1x8xf32>
    %77 = vector.shape_cast %76 : vector<1x8xf32> to vector<1x8x1xf32>
    %78 = tpu.reciprocal %77 {approx = true} : vector<1x8x1xf32> -> vector<1x8x1xf32>
    %79 = vector.broadcast %78 : vector<1x8x1xf32> to vector<1x8x8xf32>
    %80 = arith.mulf %75, %79 : vector<1x8x8xf32>
    %81 = arith.truncf %80 : vector<1x8x8xf32> to vector<1x8x8xbf16>
    "tpu.trace_start"() <{level = 10 : i32, message = "nqk,nkd->nqd"}> : () -> ()
    %cst_29 = arith.constant dense<0.000000e+00> : vector<1x8x16xf32>
    %82 = tpu.matmul %81, %69, %cst_29 {dimension_numbers = #tpu.dot_dimension_numbers<[2], [1], [1], [2], [0, 0, 0, 1, 1, 2], [0], [0]>} : vector<1x8x8xbf16>, vector<1x8x16xbf16>, vector<1x8x16xf32> -> vector<1x8x16xf32>
    "tpu.trace_stop"() : () -> ()
    %83 = vector.shape_cast %82 : vector<1x8x16xf32> to vector<8x16xf32>
    %84 = arith.truncf %83 : vector<8x16xf32> to vector<8x16xbf16>
    %c32 = arith.constant 32 : index
    %c0_30 = arith.constant 0 : index
    %85 = vector.load %arg3[%c32, %c0_30] : memref<64x64xbf16, #tpu.memory_space<vmem>>, vector<16x64xbf16>
    %cst_31 = arith.constant dense<0.000000e+00> : vector<8x64xf32>
    %86 = tpu.matmul %84, %85, %cst_31 {dimension_numbers = #tpu.dot_dimension_numbers<[1], [0], [0], [1], [0, 0, 1, 1], [], []>} : vector<8x16xbf16>, vector<16x64xbf16>, vector<8x64xf32> -> vector<8x64xf32>
    %87 = arith.addf %66, %86 : vector<8x64xf32>
    %88 = vector.extract_strided_slice %12 {offsets = [0, 0, 48], sizes = [1, 8, 16], strides = [1, 1, 1]} : vector<1x8x64xbf16> to vector<1x8x16xbf16>
    %89 = vector.extract_strided_slice %14 {offsets = [0, 0, 48], sizes = [1, 8, 16], strides = [1, 1, 1]} : vector<1x8x64xbf16> to vector<1x8x16xbf16>
    %90 = vector.extract_strided_slice %16 {offsets = [0, 0, 48], sizes = [1, 8, 16], strides = [1, 1, 1]} : vector<1x8x64xbf16> to vector<1x8x16xbf16>
    "tpu.trace_start"() <{level = 10 : i32, message = "nqd,nkd->nqk"}> : () -> ()
    %cst_32 = arith.constant dense<0.000000e+00> : vector<1x8x8xf32>
    %91 = tpu.matmul %88, %89, %cst_32 {dimension_numbers = #tpu.dot_dimension_numbers<[2], [2], [1], [1], [0, 0, 0, 1, 1, 1], [0], [0]>} : vector<1x8x16xbf16>, vector<1x8x16xbf16>, vector<1x8x8xf32> -> vector<1x8x8xf32>
    "tpu.trace_stop"() : () -> ()
    %cst_33 = arith.constant dense<0xFF800000> : vector<1x8xf32>
    %92 = vector.multi_reduction <maximumf>, %91, %cst_33 [2] : vector<1x8x8xf32> to vector<1x8xf32>
    %93 = vector.shape_cast %92 : vector<1x8xf32> to vector<1x8x1xf32>
    %94 = vector.broadcast %93 : vector<1x8x1xf32> to vector<1x8x8xf32>
    %95 = arith.subf %91, %94 : vector<1x8x8xf32>
    %96 = math.exp %95 : vector<1x8x8xf32>
    %cst_34 = arith.constant dense<0.000000e+00> : vector<1x8xf32>
    %97 = vector.multi_reduction <add>, %96, %cst_34 [2] : vector<1x8x8xf32> to vector<1x8xf32>
    %98 = vector.shape_cast %97 : vector<1x8xf32> to vector<1x8x1xf32>
    %99 = tpu.reciprocal %98 {approx = true} : vector<1x8x1xf32> -> vector<1x8x1xf32>
    %100 = vector.broadcast %99 : vector<1x8x1xf32> to vector<1x8x8xf32>
    %101 = arith.mulf %96, %100 : vector<1x8x8xf32>
    %102 = arith.truncf %101 : vector<1x8x8xf32> to vector<1x8x8xbf16>
    "tpu.trace_start"() <{level = 10 : i32, message = "nqk,nkd->nqd"}> : () -> ()
    %cst_35 = arith.constant dense<0.000000e+00> : vector<1x8x16xf32>
    %103 = tpu.matmul %102, %90, %cst_35 {dimension_numbers = #tpu.dot_dimension_numbers<[2], [1], [1], [2], [0, 0, 0, 1, 1, 2], [0], [0]>} : vector<1x8x8xbf16>, vector<1x8x16xbf16>, vector<1x8x16xf32> -> vector<1x8x16xf32>
    "tpu.trace_stop"() : () -> ()
    %104 = vector.shape_cast %103 : vector<1x8x16xf32> to vector<8x16xf32>
    %105 = arith.truncf %104 : vector<8x16xf32> to vector<8x16xbf16>
    %c48 = arith.constant 48 : index
    %c0_36 = arith.constant 0 : index
    %106 = vector.load %arg3[%c48, %c0_36] : memref<64x64xbf16, #tpu.memory_space<vmem>>, vector<16x64xbf16>
    %cst_37 = arith.constant dense<0.000000e+00> : vector<8x64xf32>
    %107 = tpu.matmul %105, %106, %cst_37 {dimension_numbers = #tpu.dot_dimension_numbers<[1], [0], [0], [1], [0, 0, 1, 1], [], []>} : vector<8x16xbf16>, vector<16x64xbf16>, vector<8x64xf32> -> vector<8x64xf32>
    %108 = arith.addf %87, %107 : vector<8x64xf32>
    %109 = vector.broadcast %18 : vector<1x64xf32> to vector<8x64xf32>
    %110 = arith.addf %108, %109 : vector<8x64xf32>
    %111 = arith.addf %110, %0 : vector<8x64xf32>
    %cst_38 = arith.constant dense<0.000000e+00> : vector<8xf32>
    %112 = vector.multi_reduction <add>, %111, %cst_38 [1] : vector<8x64xf32> to vector<8xf32>
    %113 = vector.shape_cast %112 : vector<8xf32> to vector<8x1xf32>
    %cst_39 = arith.constant 6.400000e+01 : f32
    %114 = vector.broadcast %cst_39 : f32 to vector<8x1xf32>
    %115 = arith.divf %113, %114 : vector<8x1xf32>
    %116 = vector.broadcast %115 : vector<8x1xf32> to vector<8x64xf32>
    %117 = arith.subf %111, %116 : vector<8x64xf32>
    %118 = arith.mulf %117, %117 : vector<8x64xf32>
    %cst_40 = arith.constant dense<0.000000e+00> : vector<8xf32>
    %119 = vector.multi_reduction <add>, %118, %cst_40 [1] : vector<8x64xf32> to vector<8xf32>
    %120 = vector.shape_cast %119 : vector<8xf32> to vector<8x1xf32>
    %cst_41 = arith.constant 6.400000e+01 : f32
    %121 = vector.broadcast %cst_41 : f32 to vector<8x1xf32>
    %122 = arith.divf %120, %121 : vector<8x1xf32>
    %123 = vector.broadcast %115 : vector<8x1xf32> to vector<8x64xf32>
    %124 = arith.subf %111, %123 : vector<8x64xf32>
    %cst_42 = arith.constant 9.99999974E-6 : f32
    %125 = vector.broadcast %cst_42 : f32 to vector<8x1xf32>
    %126 = arith.addf %122, %125 : vector<8x1xf32>
    %127 = math.rsqrt %126 : vector<8x1xf32>
    %128 = vector.broadcast %127 : vector<8x1xf32> to vector<8x64xf32>
    %129 = arith.mulf %124, %128 : vector<8x64xf32>
    %130 = vector.broadcast %19 : vector<1x64xf32> to vector<8x64xf32>
    %131 = arith.mulf %129, %130 : vector<8x64xf32>
    %132 = vector.broadcast %20 : vector<1x64xf32> to vector<8x64xf32>
    %133 = arith.addf %131, %132 : vector<8x64xf32>
    %134 = arith.truncf %133 : vector<8x64xf32> to vector<8x64xbf16>
    %cst_43 = arith.constant 0.000000e+00 : f32
    %135 = vector.broadcast %cst_43 : f32 to vector<8x64xf32>
    %c0_44 = arith.constant 0 : index
    %c0_45 = arith.constant 0 : index
    %136 = vector.load %arg4[%c0_44, %c0_45] : memref<64x256xbf16, #tpu.memory_space<vmem>>, vector<64x256xbf16>
    %cst_46 = arith.constant dense<0.000000e+00> : vector<8x256xf32>
    %137 = tpu.matmul %134, %136, %cst_46 {dimension_numbers = #tpu.dot_dimension_numbers<[1], [0], [0], [1], [0, 0, 1, 1], [], []>} : vector<8x64xbf16>, vector<64x256xbf16>, vector<8x256xf32> -> vector<8x256xf32>
    %c0_47 = arith.constant 0 : index
    %c0_48 = arith.constant 0 : index
    %138 = vector.load %arg5[%c0_47, %c0_48] : memref<1x256xf32, #tpu.memory_space<vmem>>, vector<1x256xf32>
    %139 = vector.broadcast %138 : vector<1x256xf32> to vector<8x256xf32>
    %140 = arith.addf %137, %139 : vector<8x256xf32>
    %cst_49 = arith.constant 0.000000e+00 : f32
    %141 = vector.broadcast %cst_49 : f32 to vector<8x256xf32>
    %142 = arith.maximumf %140, %141 : vector<8x256xf32>
    %143 = arith.truncf %142 : vector<8x256xf32> to vector<8x256xbf16>
    %c0_50 = arith.constant 0 : index
    %c0_51 = arith.constant 0 : index
    %144 = vector.load %arg6[%c0_50, %c0_51] : memref<256x64xbf16, #tpu.memory_space<vmem>>, vector<256x64xbf16>
    %cst_52 = arith.constant dense<0.000000e+00> : vector<8x64xf32>
    %145 = tpu.matmul %143, %144, %cst_52 {dimension_numbers = #tpu.dot_dimension_numbers<[1], [0], [0], [1], [0, 0, 1, 1], [], []>} : vector<8x256xbf16>, vector<256x64xbf16>, vector<8x64xf32> -> vector<8x64xf32>
    %146 = arith.addf %135, %145 : vector<8x64xf32>
    %147 = vector.broadcast %21 : vector<1x64xf32> to vector<8x64xf32>
    %148 = arith.addf %146, %147 : vector<8x64xf32>
    %149 = arith.addf %148, %133 : vector<8x64xf32>
    %cst_53 = arith.constant dense<0.000000e+00> : vector<8xf32>
    %150 = vector.multi_reduction <add>, %149, %cst_53 [1] : vector<8x64xf32> to vector<8xf32>
    %151 = vector.shape_cast %150 : vector<8xf32> to vector<8x1xf32>
    %cst_54 = arith.constant 6.400000e+01 : f32
    %152 = vector.broadcast %cst_54 : f32 to vector<8x1xf32>
    %153 = arith.divf %151, %152 : vector<8x1xf32>
    %154 = vector.broadcast %153 : vector<8x1xf32> to vector<8x64xf32>
    %155 = arith.subf %149, %154 : vector<8x64xf32>
    %156 = arith.mulf %155, %155 : vector<8x64xf32>
    %cst_55 = arith.constant dense<0.000000e+00> : vector<8xf32>
    %157 = vector.multi_reduction <add>, %156, %cst_55 [1] : vector<8x64xf32> to vector<8xf32>
    %158 = vector.shape_cast %157 : vector<8xf32> to vector<8x1xf32>
    %cst_56 = arith.constant 6.400000e+01 : f32
    %159 = vector.broadcast %cst_56 : f32 to vector<8x1xf32>
    %160 = arith.divf %158, %159 : vector<8x1xf32>
    %161 = vector.broadcast %153 : vector<8x1xf32> to vector<8x64xf32>
    %162 = arith.subf %149, %161 : vector<8x64xf32>
    %cst_57 = arith.constant 9.99999974E-6 : f32
    %163 = vector.broadcast %cst_57 : f32 to vector<8x1xf32>
    %164 = arith.addf %160, %163 : vector<8x1xf32>
    %165 = math.rsqrt %164 : vector<8x1xf32>
    %166 = vector.broadcast %165 : vector<8x1xf32> to vector<8x64xf32>
    %167 = arith.mulf %162, %166 : vector<8x64xf32>
    %168 = vector.broadcast %22 : vector<1x64xf32> to vector<8x64xf32>
    %169 = arith.mulf %167, %168 : vector<8x64xf32>
    %170 = vector.broadcast %23 : vector<1x64xf32> to vector<8x64xf32>
    %171 = arith.addf %169, %170 : vector<8x64xf32>
    %c0_58 = arith.constant 0 : index
    %c0_59 = arith.constant 0 : index
    %172 = vector.load %arg8[%c0_58, %c0_59] : memref<8x64xf32, #tpu.memory_space<vmem>>, vector<8x64xf32>
    tpu.vector_store %arg8[%c0_58, %c0_59], %171 {strides = array<i32>} : memref<8x64xf32, #tpu.memory_space<vmem>>, vector<8x64xf32>,
    return
  }
  func.func @transform_0(%arg0: i32) -> (i32, i32) {
    %c0_i32 = arith.constant 0 : i32
    %c0_i32_0 = arith.constant 0 : i32
    return %arg0, %c0_i32 : i32, i32
  }
  func.func @transform_1(%arg0: i32) -> (i32, i32, i32) {
    %c0_i32 = arith.constant 0 : i32
    %c0_i32_0 = arith.constant 0 : i32
    %c0_i32_1 = arith.constant 0 : i32
    %c0_i32_2 = arith.constant 0 : i32
    return %c0_i32, %c0_i32_0, %c0_i32_1 : i32, i32, i32
  }
  func.func @transform_2(%arg0: i32) -> (i32, i32) {
    %c0_i32 = arith.constant 0 : i32
    %c0_i32_0 = arith.constant 0 : i32
    %c0_i32_1 = arith.constant 0 : i32
    return %c0_i32, %c0_i32_0 : i32, i32
  }
  func.func @transform_3(%arg0: i32) -> (i32, i32) {
    %c0_i32 = arith.constant 0 : i32
    %c0_i32_0 = arith.constant 0 : i32
    %c0_i32_1 = arith.constant 0 : i32
    return %c0_i32, %c0_i32_0 : i32, i32
  }
  func.func @transform_4(%arg0: i32) -> (i32, i32) {
    %c0_i32 = arith.constant 0 : i32
    %c0_i32_0 = arith.constant 0 : i32
    %c0_i32_1 = arith.constant 0 : i32
    return %c0_i32, %c0_i32_0 : i32, i32
  }
  func.func @transform_5(%arg0: i32) -> (i32, i32) {
    %c0_i32 = arith.constant 0 : i32
    %c0_i32_0 = arith.constant 0 : i32
    %c0_i32_1 = arith.constant 0 : i32
    return %c0_i32, %c0_i32_0 : i32, i32
  }
  func.func @transform_6(%arg0: i32) -> (i32, i32) {
    %c0_i32 = arith.constant 0 : i32
    %c0_i32_0 = arith.constant 0 : i32
    %c0_i32_1 = arith.constant 0 : i32
    return %c0_i32, %c0_i32_0 : i32, i32
  }
  func.func @transform_7(%arg0: i32) -> (i32, i32) {
    %c0_i32 = arith.constant 0 : i32
    %c0_i32_0 = arith.constant 0 : i32
    return %arg0, %c0_i32 : i32, i32
  }
}

module attributes {stable_mosaic.version = 11 : i64} {
  func.func @transformer_block_kernel(%arg0: i32, %arg1: memref<8x64xf32, #tpu.memory_space<vmem>>, %arg2: memref<3x64x64xbf16, #tpu.memory_space<vmem>>, %arg3: memref<64x64xbf16, #tpu.memory_space<vmem>>, %arg4: memref<64x256xbf16, #tpu.memory_space<vmem>>, %arg5: memref<1x256xf32, #tpu.memory_space<vmem>>, %arg6: memref<256x64xbf16, #tpu.memory_space<vmem>>, %arg7: memref<8x64xf32, #tpu.memory_space<vmem>>, %arg8: memref<8x64xf32, #tpu.memory_space<vmem>>) attributes {dimension_semantics = [#tpu.dimension_semantics<parallel>], iteration_bounds = array<i64: 2>, scalar_prefetch = 0 : i64, scratch_operands = 0 : i64, tpu.core_type = #tpu.core_type<tc>, window_params = [{transform_indices = @transform_0, window_bounds = array<i64: 8, 64>}, {pipeline_mode = #tpu.pipeline_mode<synchronous>, transform_indices = @transform_1, window_bounds = array<i64: 3, 64, 64>}, {pipeline_mode = #tpu.pipeline_mode<synchronous>, transform_indices = @transform_2, window_bounds = array<i64: 64, 64>}, {pipeline_mode = #tpu.pipeline_mode<synchronous>, transform_indices = @transform_3, window_bounds = array<i64: 64, 256>}, {pipeline_mode = #tpu.pipeline_mode<synchronous>, transform_indices = @transform_4, window_bounds = array<i64: 1, 256>}, {pipeline_mode = #tpu.pipeline_mode<synchronous>, transform_indices = @transform_5, window_bounds = array<i64: 256, 64>}, {pipeline_mode = #tpu.pipeline_mode<synchronous>, transform_indices = @transform_6, window_bounds = array<i64: 8, 64>}, {transform_indices = @transform_7, window_bounds = array<i64: 8, 64>}]} {
    %c0 = arith.constant 0 : index
    %c0_0 = arith.constant 0 : index
    %0 = vector.load %arg1[%c0, %c0_0] : memref<8x64xf32, #tpu.memory_space<vmem>>, vector<8x64xf32>
    %1 = arith.truncf %0 : vector<8x64xf32> to vector<8x64xbf16>
    %c0_1 = arith.constant 0 : index
    %c0_2 = arith.constant 0 : index
    %c0_3 = arith.constant 0 : index
    %2 = vector.load %arg2[%c0_1, %c0_2, %c0_3] : memref<3x64x64xbf16, #tpu.memory_space<vmem>>, vector<1x64x64xbf16>
    %3 = vector.shape_cast %2 : vector<1x64x64xbf16> to vector<64x64xbf16>
    %cst = arith.constant dense<0.000000e+00> : vector<8x64xf32>
    %4 = tpu.matmul %1, %3, %cst {dimension_numbers = #tpu.dot_dimension_numbers<[1], [0], [0], [1], [0, 0, 1, 1], [], []>} : vector<8x64xbf16>, vector<64x64xbf16>, vector<8x64xf32> -> vector<8x64xf32>
    %c1 = arith.constant 1 : index
    %c0_4 = arith.constant 0 : index
    %c0_5 = arith.constant 0 : index
    %5 = vector.load %arg2[%c1, %c0_4, %c0_5] : memref<3x64x64xbf16, #tpu.memory_space<vmem>>, vector<1x64x64xbf16>
    %6 = vector.shape_cast %5 : vector<1x64x64xbf16> to vector<64x64xbf16>
    %cst_6 = arith.constant dense<0.000000e+00> : vector<8x64xf32>
    %7 = tpu.matmul %1, %6, %cst_6 {dimension_numbers = #tpu.dot_dimension_numbers<[1], [0], [0], [1], [0, 0, 1, 1], [], []>} : vector<8x64xbf16>, vector<64x64xbf16>, vector<8x64xf32> -> vector<8x64xf32>
    %c2 = arith.constant 2 : index
    %c0_7 = arith.constant 0 : index
    %c0_8 = arith.constant 0 : index
    %8 = vector.load %arg2[%c2, %c0_7, %c0_8] : memref<3x64x64xbf16, #tpu.memory_space<vmem>>, vector<1x64x64xbf16>
    %9 = vector.shape_cast %8 : vector<1x64x64xbf16> to vector<64x64xbf16>
    %cst_9 = arith.constant dense<0.000000e+00> : vector<8x64xf32>
    %10 = tpu.matmul %1, %9, %cst_9 {dimension_numbers = #tpu.dot_dimension_numbers<[1], [0], [0], [1], [0, 0, 1, 1], [], []>} : vector<8x64xbf16>, vector<64x64xbf16>, vector<8x64xf32> -> vector<8x64xf32>
    %11 = vector.shape_cast %4 : vector<8x64xf32> to vector<1x8x64xf32>
    %12 = arith.truncf %11 : vector<1x8x64xf32> to vector<1x8x64xbf16>
    %13 = vector.shape_cast %7 : vector<8x64xf32> to vector<1x8x64xf32>
    %14 = arith.truncf %13 : vector<1x8x64xf32> to vector<1x8x64xbf16>
    %15 = vector.shape_cast %10 : vector<8x64xf32> to vector<1x8x64xf32>
    %16 = arith.truncf %15 : vector<1x8x64xf32> to vector<1x8x64xbf16>
    %c0_10 = arith.constant 0 : index
    %c0_11 = arith.constant 0 : index
    %17 = vector.load %arg7[%c0_10, %c0_11] : memref<8x64xf32, #tpu.memory_space<vmem>>, vector<8x64xf32>
    %18 = vector.extract_strided_slice %17 {offsets = [0, 0], sizes = [1, 64], strides = [1, 1]} : vector<8x64xf32> to vector<1x64xf32>
    %19 = vector.extract_strided_slice %17 {offsets = [1, 0], sizes = [1, 64], strides = [1, 1]} : vector<8x64xf32> to vector<1x64xf32>
    %20 = vector.extract_strided_slice %17 {offsets = [2, 0], sizes = [1, 64], strides = [1, 1]} : vector<8x64xf32> to vector<1x64xf32>
    %21 = vector.extract_strided_slice %17 {offsets = [3, 0], sizes = [1, 64], strides = [1, 1]} : vector<8x64xf32> to vector<1x64xf32>
    %22 = vector.extract_strided_slice %17 {offsets = [4, 0], sizes = [1, 64], strides = [1, 1]} : vector<8x64xf32> to vector<1x64xf32>
    %23 = vector.extract_strided_slice %17 {offsets = [5, 0], sizes = [1, 64], strides = [1, 1]} : vector<8x64xf32> to vector<1x64xf32>
    %cst_12 = arith.constant 0.000000e+00 : f32
    %24 = vector.broadcast %cst_12 : f32 to vector<8x64xf32>
    %25 = vector.extract_strided_slice %12 {offsets = [0, 0, 0], sizes = [1, 8, 16], strides = [1, 1, 1]} : vector<1x8x64xbf16> to vector<1x8x16xbf16>
    %26 = vector.extract_strided_slice %14 {offsets = [0, 0, 0], sizes = [1, 8, 16], strides = [1, 1, 1]} : vector<1x8x64xbf16> to vector<1x8x16xbf16>
    %27 = vector.extract_strided_slice %16 {offsets = [0, 0, 0], sizes = [1, 8, 16], strides = [1, 1, 1]} : vector<1x8x64xbf16> to vector<1x8x16xbf16>
    "tpu.trace_start"() <{level = 10 : i32, message = "nqd,nkd->nqk"}> : () -> ()
    %cst_13 = arith.constant dense<0.000000e+00> : vector<1x8x8xf32>
    %28 = tpu.matmul %25, %26, %cst_13 {dimension_numbers = #tpu.dot_dimension_numbers<[2], [2], [1], [1], [0, 0, 0, 1, 1, 1], [0], [0]>} : vector<1x8x16xbf16>, vector<1x8x16xbf16>, vector<1x8x8xf32> -> vector<1x8x8xf32>
    "tpu.trace_stop"() : () -> ()
    %cst_14 = arith.constant dense<0xFF800000> : vector<1x8xf32>
    %29 = vector.multi_reduction <maximumf>, %28, %cst_14 [2] : vector<1x8x8xf32> to vector<1x8xf32>
    %30 = vector.shape_cast %29 : vector<1x8xf32> to vector<1x8x1xf32>
    %31 = vector.broadcast %30 : vector<1x8x1xf32> to vector<1x8x8xf32>
    %32 = arith.subf %28, %31 : vector<1x8x8xf32>
    %33 = math.exp %32 : vector<1x8x8xf32>
    %cst_15 = arith.constant dense<0.000000e+00> : vector<1x8xf32>
    %34 = vector.multi_reduction <add>, %33, %cst_15 [2] : vector<1x8x8xf32> to vector<1x8xf32>
    %35 = vector.shape_cast %34 : vector<1x8xf32> to vector<1x8x1xf32>
    %36 = tpu.reciprocal %35 {approx = true} : vector<1x8x1xf32> -> vector<1x8x1xf32>
    %37 = vector.broadcast %36 : vector<1x8x1xf32> to vector<1x8x8xf32>
    %38 = arith.mulf %33, %37 : vector<1x8x8xf32>
    %39 = arith.truncf %38 : vector<1x8x8xf32> to vector<1x8x8xbf16>
    "tpu.trace_start"() <{level = 10 : i32, message = "nqk,nkd->nqd"}> : () -> ()
    %cst_16 = arith.constant dense<0.000000e+00> : vector<1x8x16xf32>
    %40 = tpu.matmul %39, %27, %cst_16 {dimension_numbers = #tpu.dot_dimension_numbers<[2], [1], [1], [2], [0, 0, 0, 1, 1, 2], [0], [0]>} : vector<1x8x8xbf16>, vector<1x8x16xbf16>, vector<1x8x16xf32> -> vector<1x8x16xf32>
    "tpu.trace_stop"() : () -> ()
    %41 = vector.shape_cast %40 : vector<1x8x16xf32> to vector<8x16xf32>
    %42 = arith.truncf %41 : vector<8x16xf32> to vector<8x16xbf16>
    %c0_17 = arith.constant 0 : index
    %c0_18 = arith.constant 0 : index
    %43 = vector.load %arg3[%c0_17, %c0_18] : memref<64x64xbf16, #tpu.memory_space<vmem>>, vector<16x64xbf16>
    %cst_19 = arith.constant dense<0.000000e+00> : vector<8x64xf32>
    %44 = tpu.matmul %42, %43, %cst_19 {dimension_numbers = #tpu.dot_dimension_numbers<[1], [0], [0], [1], [0, 0, 1, 1], [], []>} : vector<8x16xbf16>, vector<16x64xbf16>, vector<8x64xf32> -> vector<8x64xf32>
    %45 = arith.addf %24, %44 : vector<8x64xf32>
    %46 = vector.extract_strided_slice %12 {offsets = [0, 0, 16], sizes = [1, 8, 16], strides = [1, 1, 1]} : vector<1x8x64xbf16> to vector<1x8x16xbf16>
    %47 = vector.extract_strided_slice %14 {offsets = [0, 0, 16], sizes = [1, 8, 16], strides = [1, 1, 1]} : vector<1x8x64xbf16> to vector<1x8x16xbf16>
    %48 = vector.extract_strided_slice %16 {offsets = [0, 0, 16], sizes = [1, 8, 16], strides = [1, 1, 1]} : vector<1x8x64xbf16> to vector<1x8x16xbf16>
    "tpu.trace_start"() <{level = 10 : i32, message = "nqd,nkd->nqk"}> : () -> ()
    %cst_20 = arith.constant dense<0.000000e+00> : vector<1x8x8xf32>
    %49 = tpu.matmul %46, %47, %cst_20 {dimension_numbers = #tpu.dot_dimension_numbers<[2], [2], [1], [1], [0, 0, 0, 1, 1, 1], [0], [0]>} : vector<1x8x16xbf16>, vector<1x8x16xbf16>, vector<1x8x8xf32> -> vector<1x8x8xf32>
    "tpu.trace_stop"() : () -> ()
    %cst_21 = arith.constant dense<0xFF800000> : vector<1x8xf32>
    %50 = vector.multi_reduction <maximumf>, %49, %cst_21 [2] : vector<1x8x8xf32> to vector<1x8xf32>
    %51 = vector.shape_cast %50 : vector<1x8xf32> to vector<1x8x1xf32>
    %52 = vector.broadcast %51 : vector<1x8x1xf32> to vector<1x8x8xf32>
    %53 = arith.subf %49, %52 : vector<1x8x8xf32>
    %54 = math.exp %53 : vector<1x8x8xf32>
    %cst_22 = arith.constant dense<0.000000e+00> : vector<1x8xf32>
    %55 = vector.multi_reduction <add>, %54, %cst_22 [2] : vector<1x8x8xf32> to vector<1x8xf32>
    %56 = vector.shape_cast %55 : vector<1x8xf32> to vector<1x8x1xf32>
    %57 = tpu.reciprocal %56 {approx = true} : vector<1x8x1xf32> -> vector<1x8x1xf32>
    %58 = vector.broadcast %57 : vector<1x8x1xf32> to vector<1x8x8xf32>
    %59 = arith.mulf %54, %58 : vector<1x8x8xf32>
    %60 = arith.truncf %59 : vector<1x8x8xf32> to vector<1x8x8xbf16>
    "tpu.trace_start"() <{level = 10 : i32, message = "nqk,nkd->nqd"}> : () -> ()
    %cst_23 = arith.constant dense<0.000000e+00> : vector<1x8x16xf32>
    %61 = tpu.matmul %60, %48, %cst_23 {dimension_numbers = #tpu.dot_dimension_numbers<[2], [1], [1], [2], [0, 0, 0, 1, 1, 2], [0], [0]>} : vector<1x8x8xbf16>, vector<1x8x16xbf16>, vector<1x8x16xf32> -> vector<1x8x16xf32>
    "tpu.trace_stop"() : () -> ()
    %62 = vector.shape_cast %61 : vector<1x8x16xf32> to vector<8x16xf32>
    %63 = arith.truncf %62 : vector<8x16xf32> to vector<8x16xbf16>
    %c16 = arith.constant 16 : index
    %c0_24 = arith.constant 0 : index
    %64 = vector.load %arg3[%c16, %c0_24] : memref<64x64xbf16, #tpu.memory_space<vmem>>, vector<16x64xbf16>
    %cst_25 = arith.constant dense<0.000000e+00> : vector<8x64xf32>
    %65 = tpu.matmul %63, %64, %cst_25 {dimension_numbers = #tpu.dot_dimension_numbers<[1], [0], [0], [1], [0, 0, 1, 1], [], []>} : vector<8x16xbf16>, vector<16x64xbf16>, vector<8x64xf32> -> vector<8x64xf32>
    %66 = arith.addf %45, %65 : vector<8x64xf32>
    %67 = vector.extract_strided_slice %12 {offsets = [0, 0, 32], sizes = [1, 8, 16], strides = [1, 1, 1]} : vector<1x8x64xbf16> to vector<1x8x16xbf16>
    %68 = vector.extract_strided_slice %14 {offsets = [0, 0, 32], sizes = [1, 8, 16], strides = [1, 1, 1]} : vector<1x8x64xbf16> to vector<1x8x16xbf16>
    %69 = vector.extract_strided_slice %16 {offsets = [0, 0, 32], sizes = [1, 8, 16], strides = [1, 1, 1]} : vector<1x8x64xbf16> to vector<1x8x16xbf16>
    "tpu.trace_start"() <{level = 10 : i32, message = "nqd,nkd->nqk"}> : () -> ()
    %cst_26 = arith.constant dense<0.000000e+00> : vector<1x8x8xf32>
    %70 = tpu.matmul %67, %68, %cst_26 {dimension_numbers = #tpu.dot_dimension_numbers<[2], [2], [1], [1], [0, 0, 0, 1, 1, 1], [0], [0]>} : vector<1x8x16xbf16>, vector<1x8x16xbf16>, vector<1x8x8xf32> -> vector<1x8x8xf32>
    "tpu.trace_stop"() : () -> ()
    %cst_27 = arith.constant dense<0xFF800000> : vector<1x8xf32>
    %71 = vector.multi_reduction <maximumf>, %70, %cst_27 [2] : vector<1x8x8xf32> to vector<1x8xf32>
    %72 = vector.shape_cast %71 : vector<1x8xf32> to vector<1x8x1xf32>
    %73 = vector.broadcast %72 : vector<1x8x1xf32> to vector<1x8x8xf32>
    %74 = arith.subf %70, %73 : vector<1x8x8xf32>
    %75 = math.exp %74 : vector<1x8x8xf32>
    %cst_28 = arith.constant dense<0.000000e+00> : vector<1x8xf32>
    %76 = vector.multi_reduction <add>, %75, %cst_28 [2] : vector<1x8x8xf32> to vector<1x8xf32>
    %77 = vector.shape_cast %76 : vector<1x8xf32> to vector<1x8x1xf32>
    %78 = tpu.reciprocal %77 {approx = true} : vector<1x8x1xf32> -> vector<1x8x1xf32>
    %79 = vector.broadcast %78 : vector<1x8x1xf32> to vector<1x8x8xf32>
    %80 = arith.mulf %75, %79 : vector<1x8x8xf32>
    %81 = arith.truncf %80 : vector<1x8x8xf32> to vector<1x8x8xbf16>
    "tpu.trace_start"() <{level = 10 : i32, message = "nqk,nkd->nqd"}> : () -> ()
    %cst_29 = arith.constant dense<0.000000e+00> : vector<1x8x16xf32>
    %82 = tpu.matmul %81, %69, %cst_29 {dimension_numbers = #tpu.dot_dimension_numbers<[2], [1], [1], [2], [0, 0, 0, 1, 1, 2], [0], [0]>} : vector<1x8x8xbf16>, vector<1x8x16xbf16>, vector<1x8x16xf32> -> vector<1x8x16xf32>
    "tpu.trace_stop"() : () -> ()
    %83 = vector.shape_cast %82 : vector<1x8x16xf32> to vector<8x16xf32>
    %84 = arith.truncf %83 : vector<8x16xf32> to vector<8x16xbf16>
    %c32 = arith.constant 32 : index
    %c0_30 = arith.constant 0 : index
    %85 = vector.load %arg3[%c32, %c0_30] : memref<64x64xbf16, #tpu.memory_space<vmem>>, vector<16x64xbf16>
    %cst_31 = arith.constant dense<0.000000e+00> : vector<8x64xf32>
    %86 = tpu.matmul %84, %85, %cst_31 {dimension_numbers = #tpu.dot_dimension_numbers<[1], [0], [0], [1], [0, 0, 1, 1], [], []>} : vector<8x16xbf16>, vector<16x64xbf16>, vector<8x64xf32> -> vector<8x64xf32>
    %87 = arith.addf %66, %86 : vector<8x64xf32>
    %88 = vector.extract_strided_slice %12 {offsets = [0, 0, 48], sizes = [1, 8, 16], strides = [1, 1, 1]} : vector<1x8x64xbf16> to vector<1x8x16xbf16>
    %89 = vector.extract_strided_slice %14 {offsets = [0, 0, 48], sizes = [1, 8, 16], strides = [1, 1, 1]} : vector<1x8x64xbf16> to vector<1x8x16xbf16>
    %90 = vector.extract_strided_slice %16 {offsets = [0, 0, 48], sizes = [1, 8, 16], strides = [1, 1, 1]} : vector<1x8x64xbf16> to vector<1x8x16xbf16>
    "tpu.trace_start"() <{level = 10 : i32, message = "nqd,nkd->nqk"}> : () -> ()
    %cst_32 = arith.constant dense<0.000000e+00> : vector<1x8x8xf32>
    %91 = tpu.matmul %88, %89, %cst_32 {dimension_numbers = #tpu.dot_dimension_numbers<[2], [2], [1], [1], [0, 0, 0, 1, 1, 1], [0], [0]>} : vector<1x8x16xbf16>, vector<1x8x16xbf16>, vector<1x8x8xf32> -> vector<1x8x8xf32>
    "tpu.trace_stop"() : () -> ()
    %cst_33 = arith.constant dense<0xFF800000> : vector<1x8xf32>
    %92 = vector.multi_reduction <maximumf>, %91, %cst_33 [2] : vector<1x8x8xf32> to vector<1x8xf32>
    %93 = vector.shape_cast %92 : vector<1x8xf32> to vector<1x8x1xf32>
    %94 = vector.broadcast %93 : vector<1x8x1xf32> to vector<1x8x8xf32>
    %95 = arith.subf %91, %94 : vector<1x8x8xf32>
    %96 = math.exp %95 : vector<1x8x8xf32>
    %cst_34 = arith.constant dense<0.000000e+00> : vector<1x8xf32>
    %97 = vector.multi_reduction <add>, %96, %cst_34 [2] : vector<1x8x8xf32> to vector<1x8xf32>
    %98 = vector.shape_cast %97 : vector<1x8xf32> to vector<1x8x1xf32>
    %99 = tpu.reciprocal %98 {approx = true} : vector<1x8x1xf32> -> vector<1x8x1xf32>
    %100 = vector.broadcast %99 : vector<1x8x1xf32> to vector<1x8x8xf32>
    %101 = arith.mulf %96, %100 : vector<1x8x8xf32>
    %102 = arith.truncf %101 : vector<1x8x8xf32> to vector<1x8x8xbf16>
    "tpu.trace_start"() <{level = 10 : i32, message = "nqk,nkd->nqd"}> : () -> ()
    %cst_35 = arith.constant dense<0.000000e+00> : vector<1x8x16xf32>
    %103 = tpu.matmul %102, %90, %cst_35 {dimension_numbers = #tpu.dot_dimension_numbers<[2], [1], [1], [2], [0, 0, 0, 1, 1, 2], [0], [0]>} : vector<1x8x8xbf16>, vector<1x8x16xbf16>, vector<1x8x16xf32> -> vector<1x8x16xf32>
    "tpu.trace_stop"() : () -> ()
    %104 = vector.shape_cast %103 : vector<1x8x16xf32> to vector<8x16xf32>
    %105 = arith.truncf %104 : vector<8x16xf32> to vector<8x16xbf16>
    %c48 = arith.constant 48 : index
    %c0_36 = arith.constant 0 : index
    %106 = vector.load %arg3[%c48, %c0_36] : memref<64x64xbf16, #tpu.memory_space<vmem>>, vector<16x64xbf16>
    %cst_37 = arith.constant dense<0.000000e+00> : vector<8x64xf32>
    %107 = tpu.matmul %105, %106, %cst_37 {dimension_numbers = #tpu.dot_dimension_numbers<[1], [0], [0], [1], [0, 0, 1, 1], [], []>} : vector<8x16xbf16>, vector<16x64xbf16>, vector<8x64xf32> -> vector<8x64xf32>
    %108 = arith.addf %87, %107 : vector<8x64xf32>
    %109 = vector.broadcast %18 : vector<1x64xf32> to vector<8x64xf32>
    %110 = arith.addf %108, %109 : vector<8x64xf32>
    %111 = arith.addf %110, %0 : vector<8x64xf32>
    %cst_38 = arith.constant dense<0.000000e+00> : vector<8xf32>
    %112 = vector.multi_reduction <add>, %111, %cst_38 [1] : vector<8x64xf32> to vector<8xf32>
    %113 = vector.shape_cast %112 : vector<8xf32> to vector<8x1xf32>
    %cst_39 = arith.constant 6.400000e+01 : f32
    %114 = vector.broadcast %cst_39 : f32 to vector<8x1xf32>
    %115 = arith.divf %113, %114 : vector<8x1xf32>
    %116 = vector.broadcast %115 : vector<8x1xf32> to vector<8x64xf32>
    %117 = arith.subf %111, %116 : vector<8x64xf32>
    %118 = arith.mulf %117, %117 : vector<8x64xf32>
    %cst_40 = arith.constant dense<0.000000e+00> : vector<8xf32>
    %119 = vector.multi_reduction <add>, %118, %cst_40 [1] : vector<8x64xf32> to vector<8xf32>
    %120 = vector.shape_cast %119 : vector<8xf32> to vector<8x1xf32>
    %cst_41 = arith.constant 6.400000e+01 : f32
    %121 = vector.broadcast %cst_41 : f32 to vector<8x1xf32>
    %122 = arith.divf %120, %121 : vector<8x1xf32>
    %123 = vector.broadcast %115 : vector<8x1xf32> to vector<8x64xf32>
    %124 = arith.subf %111, %123 : vector<8x64xf32>
    %cst_42 = arith.constant 9.99999974E-6 : f32
    %125 = vector.broadcast %cst_42 : f32 to vector<8x1xf32>
    %126 = arith.addf %122, %125 : vector<8x1xf32>
    %127 = math.rsqrt %126 : vector<8x1xf32>
    %128 = vector.broadcast %127 : vector<8x1xf32> to vector<8x64xf32>
    %129 = arith.mulf %124, %128 : vector<8x64xf32>
    %130 = vector.broadcast %19 : vector<1x64xf32> to vector<8x64xf32>
    %131 = arith.mulf %129, %130 : vector<8x64xf32>
    %132 = vector.broadcast %20 : vector<1x64xf32> to vector<8x64xf32>
    %133 = arith.addf %131, %132 : vector<8x64xf32>
    %134 = arith.truncf %133 : vector<8x64xf32> to vector<8x64xbf16>
    %cst_43 = arith.constant 0.000000e+00 : f32
    %135 = vector.broadcast %cst_43 : f32 to vector<8x64xf32>
    %c0_44 = arith.constant 0 : index
    %c0_45 = arith.constant 0 : index
    %136 = vector.load %arg4[%c0_44, %c0_45] : memref<64x256xbf16, #tpu.memory_space<vmem>>, vector<64x256xbf16>
    %cst_46 = arith.constant dense<0.000000e+00> : vector<8x256xf32>
    %137 = tpu.matmul %134, %136, %cst_46 {dimension_numbers = #tpu.dot_dimension_numbers<[1], [0], [0], [1], [0, 0, 1, 1], [], []>} : vector<8x64xbf16>, vector<64x256xbf16>, vector<8x256xf32> -> vector<8x256xf32>
    %c0_47 = arith.constant 0 : index
    %c0_48 = arith.constant 0 : index
    %138 = vector.load %arg5[%c0_47, %c0_48] : memref<1x256xf32, #tpu.memory_space<vmem>>, vector<1x256xf32>
    %139 = vector.broadcast %138 : vector<1x256xf32> to vector<8x256xf32>
    %140 = arith.addf %137, %139 : vector<8x256xf32>
    %cst_49 = arith.constant 0.000000e+00 : f32
    %141 = vector.broadcast %cst_49 : f32 to vector<8x256xf32>
    %142 = arith.maximumf %140, %141 : vector<8x256xf32>
    %143 = arith.truncf %142 : vector<8x256xf32> to vector<8x256xbf16>
    %c0_50 = arith.constant 0 : index
    %c0_51 = arith.constant 0 : index
    %144 = vector.load %arg6[%c0_50, %c0_51] : memref<256x64xbf16, #tpu.memory_space<vmem>>, vector<256x64xbf16>
    %cst_52 = arith.constant dense<0.000000e+00> : vector<8x64xf32>
    %145 = tpu.matmul %143, %144, %cst_52 {dimension_numbers = #tpu.dot_dimension_numbers<[1], [0], [0], [1], [0, 0, 1, 1], [], []>} : vector<8x256xbf16>, vector<256x64xbf16>, vector<8x64xf32> -> vector<8x64xf32>
    %146 = arith.addf %135, %145 : vector<8x64xf32>
    %147 = vector.broadcast %21 : vector<1x64xf32> to vector<8x64xf32>
    %148 = arith.addf %146, %147 : vector<8x64xf32>
    %149 = arith.addf %148, %133 : vector<8x64xf32>
    %cst_53 = arith.constant dense<0.000000e+00> : vector<8xf32>
    %150 = vector.multi_reduction <add>, %149, %cst_53 [1] : vector<8x64xf32> to vector<8xf32>
    %151 = vector.shape_cast %150 : vector<8xf32> to vector<8x1xf32>
    %cst_54 = arith.constant 6.400000e+01 : f32
    %152 = vector.broadcast %cst_54 : f32 to vector<8x1xf32>
    %153 = arith.divf %151, %152 : vector<8x1xf32>
    %154 = vector.broadcast %153 : vector<8x1xf32> to vector<8x64xf32>
    %155 = arith.subf %149, %154 : vector<8x64xf32>
    %156 = arith.mulf %155, %155 : vector<8x64xf32>
    %cst_55 = arith.constant dense<0.000000e+00> : vector<8xf32>
    %157 = vector.multi_reduction <add>, %156, %cst_55 [1] : vector<8x64xf32> to vector<8xf32>
    %158 = vector.shape_cast %157 : vector<8xf32> to vector<8x1xf32>
    %cst_56 = arith.constant 6.400000e+01 : f32
    %159 = vector.broadcast %cst_56 : f32 to vector<8x1xf32>
    %160 = arith.divf %158, %159 : vector<8x1xf32>
    %161 = vector.broadcast %153 : vector<8x1xf32> to vector<8x64xf32>
    %162 = arith.subf %149, %161 : vector<8x64xf32>
    %cst_57 = arith.constant 9.99999974E-6 : f32
    %163 = vector.broadcast %cst_57 : f32 to vector<8x1xf32>
    %164 = arith.addf %160, %163 : vector<8x1xf32>
    %165 = math.rsqrt %164 : vector<8x1xf32>
    %166 = vector.broadcast %165 : vector<8x1xf32> to vector<8x64xf32>
    %167 = arith.mulf %162, %166 : vector<8x64xf32>
    %168 = vector.broadcast %22 : vector<1x64xf32> to vector<8x64xf32>
    %169 = arith.mulf %167, %168 : vector<8x64xf32>
    %170 = vector.broadcast %23 : vector<1x64xf32> to vector<8x64xf32>
    %171 = arith.addf %169, %170 : vector<8x64xf32>
    %c0_58 = arith.constant 0 : index
    %c0_59 = arith.constant 0 : index
    %172 = vector.load %arg8[%c0_58, %c0_59] : memref<8x64xf32, #tpu.memory_space<vmem>>, vector<8x64xf32>
    tpu.vector_store %arg8[%c0_58, %c0_59], %171 {strides = array<i32>} : memref<8x64xf32, #tpu.memory_space<vmem>>, vector<8x64xf32>,
    return
  }
  func.func @transform_0(%arg0: i32) -> (i32, i32) {
    %c0_i32 = arith.constant 0 : i32
    %c0_i32_0 = arith.constant 0 : i32
    return %arg0, %c0_i32 : i32, i32
  }
  func.func @transform_1(%arg0: i32) -> (i32, i32, i32) {
    %c0_i32 = arith.constant 0 : i32
    %c0_i32_0 = arith.constant 0 : i32
    %c0_i32_1 = arith.constant 0 : i32
    %c0_i32_2 = arith.constant 0 : i32
    return %c0_i32, %c0_i32_0, %c0_i32_1 : i32, i32, i32
  }
  func.func @transform_2(%arg0: i32) -> (i32, i32) {
    %c0_i32 = arith.constant 0 : i32
    %c0_i32_0 = arith.constant 0 : i32
    %c0_i32_1 = arith.constant 0 : i32
    return %c0_i32, %c0_i32_0 : i32, i32
  }
  func.func @transform_3(%arg0: i32) -> (i32, i32) {
    %c0_i32 = arith.constant 0 : i32
    %c0_i32_0 = arith.constant 0 : i32
    %c0_i32_1 = arith.constant 0 : i32
    return %c0_i32, %c0_i32_0 : i32, i32
  }
  func.func @transform_4(%arg0: i32) -> (i32, i32) {
    %c0_i32 = arith.constant 0 : i32
    %c0_i32_0 = arith.constant 0 : i32
    %c0_i32_1 = arith.constant 0 : i32
    return %c0_i32, %c0_i32_0 : i32, i32
  }
  func.func @transform_5(%arg0: i32) -> (i32, i32) {
    %c0_i32 = arith.constant 0 : i32
    %c0_i32_0 = arith.constant 0 : i32
    %c0_i32_1 = arith.constant 0 : i32
    return %c0_i32, %c0_i32_0 : i32, i32
  }
  func.func @transform_6(%arg0: i32) -> (i32, i32) {
    %c0_i32 = arith.constant 0 : i32
    %c0_i32_0 = arith.constant 0 : i32
    %c0_i32_1 = arith.constant 0 : i32
    return %c0_i32, %c0_i32_0 : i32, i32
  }
  func.func @transform_7(%arg0: i32) -> (i32, i32) {
    %c0_i32 = arith.constant 0 : i32
    %c0_i32_0 = arith.constant 0 : i32
    return %arg0, %c0_i32 : i32, i32
  }
}

</mosaic_0001>

<bundles_post_ra>
// kernel: tpu_custom_call.1
= control target key start
LH: loop header
LB: loop body
LE: loop exit
PB: predicated region body
PF: predicated region fallthrough
CT: control target
= control target key end

     0   :  { %12 = vsyncpa [#allocation3], 0  ;;  %s2539_s0 = inlined_call_operand.hbm [shape: f32[16,64], index: 0, kind: input, shape index: {}]   ;;  %s2540_s1 = inlined_call_operand.vmem [shape: bf16[3,64,64], index: 1, kind: input, shape index: {}]   ;;  %s2541_s2 = inlined_call_operand.vmem [shape: bf16[64,64], index: 2, kind: input, shape index: {}]   ;;  %s2542_s3 = inlined_call_operand.vmem [shape: bf16[64,256], index: 3, kind: input, shape index: {}]   ;;  %s2543_s4 = inlined_call_operand.vmem [shape: f32[1,256], index: 4, kind: input, shape index: {}]   ;;  %s2544_s5 = inlined_call_operand.vmem [shape: bf16[256,64], index: 5, kind: input, shape index: {}]   ;;  %s2545_s6 = inlined_call_operand.vmem [shape: f32[8,64], index: 6, kind: input, shape index: {}]   ;;  %s2546_s7 = inlined_call_operand.hbm [shape: f32[16,64], index: 7, kind: output, shape index: {}]  }
   0x1   :  { %14 = vsyncpa [#allocation3 + $0x1], 0 }
   0x2   :  { %15 = vsyncpa [#allocation4], 0 }
   0x3   :  { %17 = vsyncpa [#allocation4 + $0x1], 0  ;;  %s2108_s24 = smov 0   ;;  %s2110_s25 = smov 0  }
   0x4   :  { %s2112_s26 = smov 0   ;;  %s2114_s27 = smov 0  }
   0x5 LB: > { %s2129_s28 = sadd.s32 4294967295, %s2058_s27   ;;  %s1593_s29 = sadd.s32 4294967294, %s2058_s27   ;;  %s2058_s27 = sphi %s2114_s27, %s2561_s27   ;;  %s2054_s26 = sphi %s2112_s26, %s2560_s26   ;;  %s2050_s25 = sphi %s2110_s25, %s2559_s25   ;;  %s2046_s24 = sphi %s2108_s24, %s2558_s24  }
   0x6   : > { %s2133_s30 = sadd.s32 1, %s2058_s27   ;;  %s30_s8 = sadd.s32 1, %s2054_s26 }
   0x7   : > { %s27_s9 = ssub.s32 %s2058_s27, %s2133_s30  ;;  %p37_p0 = scmp.ne.s32.totalorder %s2054_s26, %s2050_s25 }
   0x8   : > { %p28_p1 = scmp.eq.s32.totalorder %s27_s9, 0  ;;  %p38_p2 = scmp.eq.s32.totalorder %s2058_s27, 0 }
   0x9   : > { %p43_p3 = scmp.ne.s32.totalorder %s2050_s25, %s2046_s24  ;;  %p44_p4 = scmp.eq.s32.totalorder %s2129_s28, 0 }
   0xa   : > { %s2145_s10 = scalar_select %p28_p1, %s2054_s26, %s30_s8  }
   0xb   : > { %p2147_p5 = por %p38_p2, %p37_p0  ;;  %p2151_p6 = por %p44_p4, %p43_p3 }
   0xc   : > { %p193_p7 = scmp.eq.s32.totalorder %s2129_s28, 1  ;;  %p199_p8 = scmp.eq.s32.totalorder %s1593_s29, 1 }
   0xd   : > { %p1858_p10 = scmp.lt.s32.totalorder %s2058_s27, 2  ;;  %s237_s15 = sand.u32 1, %s2054_s26  }
   0xe   : > { %p2158_p11 = por %p193_p7, %p37_p0  ;;  %p2162_p12 = por %p199_p8, %p43_p3 }
   0xf   : > { %s1597_s16 = sshll.u32 %s2058_s27, 7  ;;  %s1596_s17 = sshll.u32 %s237_s15, 3 }
  0x10   : > { %s2550_s13 = scalar_select %p2158_p11, 1, 0 }
  0x11   : > { %s2551_s14 = scalar_select %p2162_p12, 1, 0 }
  0x12   : > { %s2171_s20 = scalar_lea.hbm %s2539_s0, %s1597_s16  ;;  %s241_s21 = scalar_lea.vmem [#allocation2], %s1596_s17 }
  0x13   : > { %s248_s22 = sshll.u32 %s241_s21, 4  ;;  %p2175_p13 = pnand %p1858_p10, %p2147_p5  ;;  %s2179_s22 = int_to_ptr.vmem [resolvable:$true] %s248_s22 }
  0x14   : > { %s238_s29 = scalar_lea.sflag [#allocation3], %s237_s15  ;;  %s1962_s8 = scalar_lea.hbm %s2171_s20, 128 }
  0x15   : > { %p1963_p2 = scmp.ne.s32.totalorder %s2171_s20, %s1962_s8  ;;  %p1964_p3 = pneg %p2175_p13 }
  0x16   : > { %s1967_s16 = scalar_lea.hbm %s2539_s0, 256  ;;  %p1968_p5 = scmp.lt.u32.totalorder %s2171_s20, %s2539_s0 }
  0x17   : > { %p1965_p4 = pnand %p1964_p3, %p1963_p2  ;;  %p1969_p8 = scmp.lt.u32.totalorder %s1967_s16, %s1962_s8 }
  0x18   : > { %p1971_p9 = scmp.lt.u32.totalorder %s1962_s8, %s2171_s20 }
  0x19   : > { %p1966_p7 = pneg %p1965_p4  ;;  %p1970_p10 = por %p1969_p8, %p1968_p5 }
  0x1b   : > { %p1972_p0 = por %p1971_p9, %p1970_p10 }
  0x1d   : > { %p1973_p1 = pnand %p1972_p0, %p1966_p7 }
  0x1f   : > { %1976 = shalt.err (!%p1973_p1)
}
  0x20   : > { %s1977_s15 = scalar_lea.vmem %s2179_s22, 128  ;;  %s2060_s19 = smov [#allocation2]  }
  0x21   : > { %p1978_p2 = scmp.ne.s32.totalorder %s2179_s22, %s1977_s15  ;;  %s1982_s21 = sshll.u32 %s2060_s19, 4  ;;  %s1983_s21 = int_to_ptr.vmem [resolvable:$false] %s1982_s21 }
  0x22   : > { %s1984_s9 = scalar_lea.vmem %s1983_s21, 256  ;;  %p1985_p11 = scmp.lt.s32.totalorder %s2179_s22, %s1983_s21 }
  0x23   : > { %p1980_p4 = pnand %p1978_p2, %p1964_p3  ;;  %p1986_p5 = scmp.lt.s32.totalorder %s1984_s9, %s1977_s15 }
  0x25   : > { %p1981_p12 = pneg %p1980_p4  ;;  %p1987_p8 = por %p1986_p5, %p1985_p11 }
  0x27   : > { %p1988_p9 = pnand %p1987_p8, %p1981_p12 }
  0x29   : > { %1991 = shalt.err (!%p1988_p9)
}
  0x2a   : > { %1853 = dma.hbm_to_vmem [thread:$0]  (!%p2175_p13), %s2171_s20, 128, %s2179_s22, %s238_s29  }
  0x2b   : > { %p2553_p0 = scmp.lt.s32.totalorder %s2058_s27, 3  ;;  %p2554_p1 = scmp.ge.s32.totalorder %s2058_s27, 1 }
  0x2d   : > { %p254_p3 = pnand %p2554_p1, %p2553_p0 }
  0x2e   : > { %s2213_s8 = sand.u32 (!%p254_p3), 1, %s2050_s25  }
  0x2f   : > { %257 = sbr.rel (%p254_p3) target bundleno = 3737 (0xe99), region = 48  ;;  %s1599_s11 = sshll.u32 (!%p254_p3), %s2213_s8, 3 }
  0x30   : > { %s260_s16 = scalar_lea.sflag (!%p254_p3), [#allocation3], %s2213_s8  ;;  %s263_s23 = scalar_lea.vmem (!%p254_p3), [#allocation2], %s1599_s11 }
  0x36   : > { %2037 = dma.done.wait (%p2151_p6), %s260_s16, 128  }
  0x37   : > { %2039 = vsyncadd (%p2151_p6), %s260_s16, 4294967168  ;;  %v2061_v0 = vmov 0.0   ;;  %vm2062_vm0 = vmmov 0   ;;  %v1898_v1 = vld [vmem:[%s2540_s1 + $0x20] sm:$0xff]   ;;  %v1899_v2 = vld [vmem:[%s2540_s1 + $0x28] sm:$0xff]   ;;  %vm329_vm1 = vcmask 523264  }
  0x38   : > { %1750 = vmatprep.subr.bf16.mxu1 %v2061_v0  ;;  %1738 = vmatprep.subr.bf16.mxu0 %v2061_v0  ;;  %v1900_v3 = vld [vmem:[%s2540_s1] sm:$0xff]   ;;  %v1902_v4 = vld [vmem:[%s2540_s1 + $0x8] sm:$0xff]   ;;  %v1901_v5 = vld [vmem:[%s2540_s1 + $0x30] sm:$0xff]   ;;  %vm523_vm2 = vcmask 130048   ;;  %s2063_s22 = smov 112   ;;  %vm586_vm3 = vcmask 1043456  }
  0x39   : > { %1758 = vmatprep.mubr.msk.bf16.mxu1 %vm2062_vm0, %v2061_v0  ;;  %1746 = vmatprep.mubr.msk.bf16.mxu0 %vm2062_vm0, %v2061_v0  ;;  %v1904_v6 = vld [vmem:[%s2540_s1 + $0x10] sm:$0xff]   ;;  %v1903_v7 = vld [vmem:[%s2540_s1 + $0x38] sm:$0xff]   ;;  %v2254_v8 = vld [vmem:[%s263_s23] sm:$0xff]  ;;  %vm570_vm4 = vcmask 64512   ;;  %s2064_s29 = smov 96   ;;  %s2065_s23 = smov 80  }
  0x3a   : > { %1751 = vmatpush3.bf16.msra.mxu1 %v1898_v1  ;;  %1739 = vmatpush3.bf16.msra.mxu0 %v1900_v3  ;;  %v1905_v9 = vld [vmem:[%s2540_s1 + $0x18] sm:$0xff]   ;;  %v296_v10 = vpack.c.bf16 %v2254_v8, %v2254_v8  ;;  %v1906_v11 = vld [vmem:[%s2540_s1 + $0x40] sm:$0xff]   ;;  %v1907_v12 = vld [vmem:[%s2540_s1 + $0x48] sm:$0xff]   ;;  %s1674_s12 = sshll.u32 %s2129_s28, 7  ;;  %s293_s18 = scalar_lea.vmem [#allocation5], %s1599_s11 }
  0x3b   : > { %1752 = vmatprep.subr.bf16.mxu1 %v2061_v0  ;;  %1740 = vmatprep.subr.bf16.mxu0 %v2061_v0  ;;  %v1908_v13 = vld [vmem:[%s2540_s1 + $0x50] sm:$0xff]   ;;  %v1909_v14 = vld [vmem:[%s2540_s1 + $0x58] sm:$0xff]   ;;  %v1911_v59 = vld [vmem:[%s2541_s2 + $0x8] sm:$0xff]   ;;  %s1523_s15 = sshll.u32 %s293_s18, 4  ;;  %s2494_s21 = scalar_lea.hbm %s2546_s7, %s1674_s12  ;;  %s2496_s15 = int_to_ptr.vmem [resolvable:$true] %s1523_s15 }
  0x3c   : > { %s1510_s9 = scalar_lea.sflag [#allocation4], %s2213_s8  ;;  %s1992_s16 = scalar_lea.vmem %s2496_s15, 128 }
  0x3d   : > { %p1993_p6 = scmp.ne.s32.totalorder %s2496_s15, %s1992_s16  ;;  %p2555_p11 = scmp.ne.s32.totalorder %s2550_s13, 0 }
  0x3e   : > { %1753 = vmatpush3.bf16.msra.mxu1 %v1899_v2  ;;  %1741 = vmatpush3.bf16.msra.mxu0 %v1902_v4  ;;  %v1910_v2 = vld [vmem:[%s2541_s2] sm:$0xff]   ;;  %s2067_s28 = smov [#allocation5]  }
  0x3f   : > { %1754 = vmatprep.subr.bf16.mxu1 %v2061_v0  ;;  %1742 = vmatprep.subr.bf16.mxu0 %v2061_v0  ;;  %p1994_p12 = pnand %p1993_p6, %p2555_p11  ;;  %s1996_s11 = sshll.u32 %s2067_s28, 4  ;;  %s1997_s11 = int_to_ptr.vmem [resolvable:$false] %s1996_s11 }
  0x40   : > { %s1998_s20 = scalar_lea.vmem %s1997_s11, 256  ;;  %p1999_p7 = scmp.lt.s32.totalorder %s2496_s15, %s1997_s11 }
  0x41   : > { %p1995_p13 = pneg %p1994_p12  ;;  %p2000_p10 = scmp.lt.s32.totalorder %s1998_s20, %s1992_s16 }
  0x42   : > { %1755 = vmatpush3.bf16.msra.mxu1 %v1901_v5  ;;  %1743 = vmatpush3.bf16.msra.mxu0 %v1904_v6 }
  0x43   : > { %1756 = vmatprep.subr.bf16.mxu1 %v2061_v0  ;;  %1744 = vmatprep.subr.bf16.mxu0 %v2061_v0  ;;  %p2001_p2 = por %p2000_p10, %p1999_p7 }
  0x45   : > { %p2002_p4 = pnand %p2001_p2, %p1995_p13 }
  0x46   : > { %1757 = vmatpush3.bf16.msra.mxu1 %v1903_v7  ;;  %1745 = vmatpush3.bf16.msra.mxu0 %v1905_v9 }
  0x47   : > { %1780 = vmatprep.subr.bf16.mxu1 %v2061_v0  ;;  %1762 = vmatprep.subr.bf16.mxu0 %v2061_v0 }
  0x49   : > { %1759 = vmatmul.mubr.msk.bf16.vlgmr.msra.gmra.mrb[0].mxu1 %vm329_vm1, %v296_v10  ;;  %1747 = vmatmul.mubr.msk.bf16.vlgmr.msra.gmra.mrb[0].mxu0 %vm329_vm1, %v296_v10 }
  0x4a   : > { %1782 = vmatprep.mubr.msk.bf16.mxu1 %vm2062_vm0, %v2061_v0  ;;  %1763 = vmatpush3.bf16.msra.mxu0 %v1906_v11 }
  0x4b   : > { %1770 = vmatprep.mubr.msk.bf16.mxu0 %vm2062_vm0, %v2061_v0  ;;  %1764 = vmatprep.subr.bf16.mxu0 %v2061_v0 }
  0x4e   : > { %1765 = vmatpush3.bf16.msra.mxu0 %v1907_v12 }
  0x4f   : > { %1766 = vmatprep.subr.bf16.mxu0 %v2061_v0 }
  0x52   : > { %1767 = vmatpush3.bf16.msra.mxu0 %v1908_v13 }
  0x53   : > { %1768 = vmatprep.subr.bf16.mxu0 %v2061_v0 }
  0x56   : > { %1769 = vmatpush3.bf16.msra.mxu0 %v1909_v14 }
  0x57   : > { %1774 = vmatprep.subr.bf16.mxu0 %v2061_v0 }
  0x59   : > { %1771 = vmatmul.mubr.msk.bf16.vlgmr.msra.gmra.mrb[4].mxu0 %vm329_vm1, %v296_v10 }
  0x5a   : > { %1776 = vmatprep.mubr.msk.bf16.mxu0 %vm2062_vm0, %v2061_v0 }
 0x11c   : > { %v440_v15 = vpop.f32.mrb[0].mxu1  ;;  %v367_v19 = vpop.f32.mrb[0].mxu0 }
 0x11d   : > { %v2290_v16 = vpack.c.bf16 %v440_v15, %v440_v15  ;;  %v1760_v17 = vpop.f32.mrb[1].mxu1  ;;  %v2296_v22 = vpack.c.bf16 %v367_v19, %v367_v19  ;;  %v1748_v23 = vpop.f32.mrb[1].mxu0 }
 0x11e   : > { %v443_v18 = vpop.f32.mrb[2].mxu1  ;;  %v370_v24 = vpop.f32.mrb[2].mxu0 }
 0x11f   : > { %637 = vrot.lane.b32.xlu0 %v2290_v16, %s2063_s22  ;;  %v1761_v20 = vpop.f32.mrb[3].mxu1  ;;  %v528_v21 = vsel %vm523_vm2, %v2290_v16, 0  ;;  %v1749_v25 = vpop.f32.mrb[3].mxu0 }
 0x120   : > { %1775 = vmatpush3.bf16.xpose.msra.mxu0 %v528_v21 }
 0x121   : > { %1786 = vmatprep.subr.bf16.mxu0 %v2061_v0 }
 0x123   : > { %634 = vrot.lane.b32.xlu0 %v2296_v22, %s2063_s22 }
 0x127   : > { %1777 = vmatmul.mubr.msk.bf16.vlgmr.msra.gmra.mrb[8].mxu0 %vm523_vm2, %v2296_v22 }
 0x128   : > { %1788 = vmatprep.mubr.msk.bf16.mxu0 %vm2062_vm0, %v2061_v0 }
 0x12c   : > { %v513_v26 = vpop.f32.mrb[4].mxu0 }
 0x12d   : > { %v1772_v27 = vpop.f32.mrb[5].mxu0  ;;  %v2305_v30 = vpack.c.bf16 %v513_v26, %v513_v26 }
 0x12e   : > { %v516_v28 = vpop.f32.mrb[6].mxu0 }
 0x12f   : > { %v1773_v29 = vpop.f32.mrb[7].mxu0  ;;  %v588_v31 = vsel %vm586_vm3, %v2305_v30, 0 }
 0x130   : > { %1781 = vmatpush3.bf16.msra.mxu1 %v588_v31 }
 0x131   : > { %1792 = vmatprep.subr.bf16.mxu1 %v2061_v0 }
 0x191   : > { %v638_v32 = vpop.permute.xlu0 %637 }
 0x192   : > { %v643_v33 = vsel %vm523_vm2, %v638_v32, 0 }
 0x193   : > { %1787 = vmatpush3.bf16.xpose.msra.mxu0 %v643_v33 }
 0x194   : > { %1798 = vmatprep.subr.bf16.mxu0 %v2061_v0 }
 0x195   : > { %v635_v34 = vpop.permute.xlu0 %634 }
 0x19a   : > { %1789 = vmatmul.mubr.msk.bf16.vlgmr.msra.gmra.mrb[12].mxu0 %vm523_vm2, %v635_v34 }
 0x19b   : > { %1800 = vmatprep.mubr.msk.bf16.mxu0 %vm2062_vm0, %v2061_v0  ;;  %1799 = vmatpush3.bf16.msra.mxu0 %v1911_v59 }
 0x19c   : > { %1810 = vmatprep.subr.bf16.mxu0 %v2061_v0 }
 0x1fa   : > { %v564_v35 = vpop.f32.mrb[8].mxu0 }
 0x1fb   : > { %v1778_v36 = vpop.f32.mrb[9].mxu0  ;;  %v571_v37 = vsel %vm570_vm4, %v564_v35, -inf }
 0x1fc   : > { %572 = vmax.xlane.f32.xlu1 %v571_v37  ;;  %v567_v38 = vpop.f32.mrb[10].mxu0 }
 0x1fd   : > { %v1779_v39 = vpop.f32.mrb[11].mxu0 }
 0x26d   : > { %v679_v40 = vpop.f32.mrb[12].mxu0 }
 0x26e   : > { %v1790_v41 = vpop.f32.mrb[13].mxu0  ;;  %v685_v42 = vsel %vm570_vm4, %v679_v40, -inf }
 0x26f   : > { %686 = vmax.xlane.f32.xlu1 %v685_v42  ;;  %v682_v43 = vpop.f32.mrb[14].mxu0 }
 0x270   : > { %v1791_v44 = vpop.f32.mrb[15].mxu0 }
 0x289   : > { %v573_v45 = vpop.xlane.xlu1 %572 }
 0x28a   : > { %v574_v46 = vsub.f32 %v564_v35, %v573_v45 }
 0x28c   : > { %v575_v47 = vmul.f32 1.442695, %v574_v46 }
 0x28e   : > { %1942 = vpow2.f32 %v575_v47 }
 0x298   : > { %v1943_v48 = vpop.eup %1942 }
 0x299   : > { %v577_v49 = vsel %vm570_vm4, %v1943_v48, 0.0 }
 0x29a   : > { %578 = vadd.xlane.f32.xlu0 %v577_v49 }
 0x2b0   : > { %909 = vrot.lane.b32.xlu0 %v2305_v30, %s2064_s29 }
 0x2fc   : > { %v687_v50 = vpop.xlane.xlu1 %686 }
 0x2fd   : > { %v688_v51 = vsub.f32 %v679_v40, %v687_v50 }
 0x2ff   : > { %v689_v52 = vmul.f32 1.442695, %v688_v51 }
 0x301   : > { %1944 = vpow2.f32 %v689_v52 }
 0x30b   : > { %v1945_v53 = vpop.eup %1944 }
 0x30c   : > { %v691_v54 = vsel %vm570_vm4, %v1945_v53, 0.0 }
 0x30d   : > { %692 = vadd.xlane.f32.xlu1 %v691_v54 }
 0x31e   : > { %698 = vrot.lane.b32.xlu1 %v2305_v30, %s2063_s22 }
 0x322   : > { %849 = vrot.lane.b32.xlu1 %v2290_v16, %s2064_s29 }
 0x326   : > { %847 = vrot.lane.b32.xlu1 %v2296_v22, %s2064_s29 }
 0x327   : > { %v579_v55 = vpop.xlane.xlu0 %578 }
 0x328   : > { %1946 = vrcp.f32 %v579_v55 }
 0x32b   : > { %v910_v4 = vpop.permute.xlu0 %909 }
 0x32c   : > { %v915_v10 = vsel %vm586_vm3, %v910_v4, 0 }
 0x332   : > { %v1947_v56 = vpop.eup %1946 }
 0x333   : > { %v581_v57 = vmul.f32 %v1947_v56, %v1943_v48 }
 0x335   : > { %v582_v58 = vpack.c.bf16 %v581_v57, %v581_v57 }
 0x337   : > { %1783 = vmatmul.mubr.msk.bf16.vlgmr.msra.gmra.mrb[4].mxu1 %vm570_vm4, %v582_v58 }
 0x338   : > { %1794 = vmatprep.mubr.msk.bf16.mxu1 %vm2062_vm0, %v2061_v0 }
 0x39a   : > { %v693_v60 = vpop.xlane.xlu1 %692 }
 0x39b   : > { %1948 = vrcp.f32 %v693_v60 }
 0x39e   : > { %v699_v61 = vpop.permute.xlu1 %698 }
 0x39f   : > { %v704_v62 = vsel %vm586_vm3, %v699_v61, 0 }
 0x3a0   : > { %1793 = vmatpush3.bf16.msra.mxu1 %v704_v62 }
 0x3a1   : > { %1804 = vmatprep.subr.bf16.mxu1 %v2061_v0 }
 0x3a2   : > { %v850_v12 = vpop.permute.xlu1 %849 }
 0x3a3   : > { %v855_v18 = vsel %vm523_vm2, %v850_v12, 0 }
 0x3a5   : > { %v1949_v63 = vpop.eup %1948 }
 0x3a6   : > { %v695_v1 = vmul.f32 %v1949_v63, %v1945_v53  ;;  %v848_v20 = vpop.permute.xlu1 %847 }
 0x3a8   : > { %v696_v3 = vpack.c.bf16 %v695_v1, %v695_v1 }
 0x3aa   : > { %1795 = vmatmul.mubr.msk.bf16.vlgmr.msra.gmra.mrb[8].mxu1 %vm570_vm4, %v696_v3 }
 0x3ab   : > { %1805 = vmatpush3.bf16.msra.mxu1 %v1910_v2  ;;  %1806 = vmatprep.mubr.msk.bf16.mxu1 %vm2062_vm0, %v2061_v0 }
 0x3ac   : > { %1816 = vmatprep.subr.bf16.mxu1 %v2061_v0 }
 0x40a   : > { %v624_v5 = vpop.f32.mrb[4].mxu1 }
 0x40b   : > { %v630_v6 = vpack.c.bf16 %v624_v5, %v624_v5  ;;  %v1784_v7 = vpop.f32.mrb[5].mxu1 }
 0x40c   : > { %v627_v9 = vpop.f32.mrb[6].mxu1 }
 0x40d   : > { %v1785_v11 = vpop.f32.mrb[7].mxu1  ;;  %1807 = vmatmul.mubr.msk.bf16.vlgmr.msra.gmra.mrb[12].mxu1 %vm523_vm2, %v630_v6 }
 0x40e   : > { %1817 = vmatpush3.bf16.msra.mxu1 %v915_v10  ;;  %1818 = vmatprep.mubr.msk.bf16.mxu1 %vm2062_vm0, %v2061_v0 }
 0x40f   : > { %1828 = vmatprep.subr.bf16.mxu1 %v2061_v0 }
 0x47d   : > { %v740_v13 = vpop.f32.mrb[8].mxu1 }
 0x47e   : > { %v746_v14 = vpack.c.bf16 %v740_v13, %v740_v13  ;;  %v1796_v15 = vpop.f32.mrb[9].mxu1 }
 0x47f   : > { %v743_v17 = vpop.f32.mrb[10].mxu1 }
 0x480   : > { %v1797_v19 = vpop.f32.mrb[11].mxu1  ;;  %1801 = vmatmul.mubr.msk.bf16.vlgmr.msra.gmra.mrb[16].mxu0 %vm523_vm2, %v746_v14  ;;  %v1173_v17 = vlaneseq }
 0x481   : > { %1811 = vmatpush3.bf16.xpose.msra.mxu0 %v855_v18  ;;  %1812 = vmatprep.mubr.msk.bf16.mxu0 %vm2062_vm0, %v2061_v0 }
 0x482   : > { %1822 = vmatprep.subr.bf16.mxu0 %v2061_v0  ;;  %v2384_v18 = vshrl.u32 %v1173_v17, 7 }
 0x484   : > { %v1175_v19 = vsub.s32 0, %v2384_v18 }
 0x488   : > { %1813 = vmatmul.mubr.msk.bf16.vlgmr.msra.gmra.mrb[20].mxu0 %vm523_vm2, %v848_v20  ;;  %v2390_v20 = vld [vmem:[%s2545_s6] sm:$0xff] }
 0x489   : > { %1824 = vmatprep.mubr.msk.bf16.mxu0 %vm2062_vm0, %v2061_v0 }
 0x4e0   : > { %v841_v21 = vpop.f32.mrb[12].mxu1 }
 0x4e1   : > { %v1808_v23 = vpop.f32.mrb[13].mxu1 }
 0x4e2   : > { %v844_v24 = vpop.f32.mrb[14].mxu1 }
 0x4e3   : > { %v1809_v25 = vpop.f32.mrb[15].mxu1 }
 0x553   : > { %v792_v26 = vpop.f32.mrb[16].mxu0 }
 0x554   : > { %v842_v27 = vadd.f32 %v841_v21, %v792_v26  ;;  %v1802_v28 = vpop.f32.mrb[17].mxu0  ;;  %v1176_v21 = vrot.slane %v2390_v20, %v1175_v19 }
 0x555   : > { %v795_v29 = vpop.f32.mrb[18].mxu0 }
 0x556   : > { %v1803_v31 = vpop.f32.mrb[19].mxu0 }
 0x55b   : > { %v891_v32 = vpop.f32.mrb[20].mxu0 }
 0x55c   : > { %v1814_v33 = vpop.f32.mrb[21].mxu0  ;;  %v897_v34 = vsel %vm570_vm4, %v891_v32, -inf }
 0x55d   : > { %898 = vmax.xlane.f32.xlu1 %v897_v34  ;;  %v894_v35 = vpop.f32.mrb[22].mxu0 }
 0x55e   : > { %v1815_v36 = vpop.f32.mrb[23].mxu0 }
 0x5ea   : > { %v899_v37 = vpop.xlane.xlu1 %898 }
 0x5eb   : > { %v900_v38 = vsub.f32 %v891_v32, %v899_v37  ;;  %v1916_v37 = vld [vmem:[%s2542_s3 + $0x4] ss:$8 sps:$4 sm:$0xff]  }
 0x5ed   : > { %v901_v39 = vmul.f32 1.442695, %v900_v38  ;;  %v1914_v38 = vld [vmem:[%s2542_s3] ss:$8 sps:$4 sm:$0xff]  }
 0x5ef   : > { %1950 = vpow2.f32 %v901_v39  ;;  %v1917_v39 = vld [vmem:[%s2542_s3 + $0x10] ss:$8 sps:$4 sm:$0xff]  }
 0x5f9   : > { %v1951_v40 = vpop.eup %1950 }
 0x5fa   : > { %v903_v41 = vsel %vm570_vm4, %v1951_v40, 0.0 }
 0x5fb   : > { %904 = vadd.xlane.f32.xlu0 %v903_v41  ;;  %v1920_v41 = vld [vmem:[%s2542_s3 + $0x20] ss:$8 sps:$4 sm:$0xff]  }
 0x611   : > { %1012 = vrot.lane.b32.xlu0 %v2290_v16, %s2065_s23 }
 0x615   : > { %1010 = vrot.lane.b32.xlu0 %v2296_v22, %s2065_s23  ;;  %v1912_v22 = vld [vmem:[%s2541_s2 + $0x10] sm:$0xff]  }
 0x616   : > { %1823 = vmatpush3.bf16.msra.mxu0 %v1912_v22  ;;  %v1930_v22 = vld [vmem:[%s2544_s5 + $0x50] sm:$0xff]  }
 0x617   : > { %1834 = vmatprep.subr.bf16.mxu0 %v2061_v0 }
 0x688   : > { %v905_v42 = vpop.xlane.xlu0 %904 }
 0x689   : > { %1952 = vrcp.f32 %v905_v42  ;;  %v1923_v42 = vld [vmem:[%s2542_s3 + $0x30] ss:$8 sps:$4 sm:$0xff]  }
 0x68c   : > { %v1013_v45 = vpop.permute.xlu0 %1012 }
 0x68d   : > { %v1018_v47 = vsel %vm523_vm2, %v1013_v45, 0  ;;  %v1926_v45 = vld [vmem:[%s2544_s5 + $0x40] sm:$0xff]  }
 0x690   : > { %v1011_v16 = vpop.permute.xlu0 %1010 }
 0x693   : > { %v1953_v43 = vpop.eup %1952 }
 0x694   : > { %v907_v44 = vmul.f32 %v1953_v43, %v1951_v40  ;;  %v1922_v40 = vld [vmem:[%s2542_s3 + $0x24] ss:$8 sps:$4 sm:$0xff]   ;;  %v1925_v43 = vld [vmem:[%s2542_s3 + $0x34] ss:$8 sps:$4 sm:$0xff]  }
 0x696   : > { %v908_v46 = vpack.c.bf16 %v907_v44, %v907_v44  ;;  %v2066_v44 = vmov 0  }
 0x698   : > { %1819 = vmatmul.mubr.msk.bf16.vlgmr.msra.gmra.mrb[16].mxu1 %vm570_vm4, %v908_v46  ;;  %v1927_v46 = vld [vmem:[%s2544_s5] sm:$0xff]  }
 0x699   : > { %1829 = vmatpush3.bf16.xpose.msra.mxu1 %v1018_v47  ;;  %1830 = vmatprep.mubr.msk.bf16.mxu1 %vm2062_vm0, %v2061_v0  ;;  %v1928_v47 = vld [vmem:[%s2544_s5 + $0x48] sm:$0xff]  }
 0x69a   : > { %1840 = vmatprep.subr.bf16.mxu1 %v2061_v0 }
 0x6a0   : > { %1831 = vmatmul.mubr.msk.bf16.vlgmr.msra.gmra.mrb[20].mxu1 %vm523_vm2, %v1011_v16  ;;  %v1929_v16 = vld [vmem:[%s2544_s5 + $0x8] sm:$0xff]  }
 0x6a1   : > { %1842 = vmatprep.mubr.msk.bf16.mxu1 %vm2062_vm0, %v2061_v0 }
 0x76b   : > { %v951_v48 = vpop.f32.mrb[16].mxu1 }
 0x76c   : > { %v957_v49 = vpack.c.bf16 %v951_v48, %v951_v48  ;;  %v1820_v50 = vpop.f32.mrb[17].mxu1  ;;  %v1931_v48 = vld [vmem:[%s2544_s5 + $0x10] sm:$0xff]  }
 0x76d   : > { %v954_v51 = vpop.f32.mrb[18].mxu1  ;;  %v1933_v50 = vld [vmem:[%s2544_s5 + $0x18] sm:$0xff]  }
 0x76e   : > { %v1821_v52 = vpop.f32.mrb[19].mxu1  ;;  %1825 = vmatmul.mubr.msk.bf16.vlgmr.msra.gmra.mrb[24].mxu0 %vm523_vm2, %v957_v49  ;;  %v1932_v49 = vld [vmem:[%s2544_s5 + $0x58] sm:$0xff]   ;;  %v1934_v51 = vld [vmem:[%s2544_s5 + $0x60] sm:$0xff]  }
 0x76f   : > { %1836 = vmatprep.mubr.msk.bf16.mxu0 %vm2062_vm0, %v2061_v0  ;;  %v1913_v0 = vld [vmem:[%s2541_s2 + $0x18] sm:$0xff]   ;;  %v1935_v52 = vld [vmem:[%s2544_s5 + $0x20] sm:$0xff]  }
 0x770   : > { %1841 = vmatpush3.bf16.msra.mxu1 %v1913_v0 }
 0x771   : > { %1716 = vmatprep.subr.bf16.mxu1 %v1926_v45 }
 0x773   : > { %v1054_v53 = vpop.f32.mrb[20].mxu1 }
 0x774   : > { %v1832_v54 = vpop.f32.mrb[21].mxu1  ;;  %v1060_v55 = vsel %vm570_vm4, %v1054_v53, -inf }
 0x775   : > { %1061 = vmax.xlane.f32.xlu0 %v1060_v55  ;;  %v1057_v56 = vpop.f32.mrb[22].mxu1  ;;  %v1937_v54 = vld [vmem:[%s2544_s5 + $0x28] sm:$0xff]  }
 0x776   : > { %v1833_v57 = vpop.f32.mrb[23].mxu1 }
 0x802   : > { %v1062_v58 = vpop.xlane.xlu0 %1061 }
 0x803   : > { %v1063_v59 = vsub.f32 %v1054_v53, %v1062_v58  ;;  %v1936_v53 = vld [vmem:[%s2544_s5 + $0x68] sm:$0xff]   ;;  %v1195_v58 = vsub.s32 1, %v2384_v18 }
 0x805   : > { %v1064_v60 = vmul.f32 1.442695, %v1063_v59  ;;  %v1200_v59 = vsub.s32 2, %v2384_v18 }
 0x807   : > { %1954 = vpow2.f32 %v1064_v60  ;;  %v1196_v60 = vrot.slane %v2390_v20, %v1195_v58  ;;  %v1201_v0 = vrot.slane %v2390_v20, %v1200_v59 }
 0x811   : > { %v1955_v61 = vpop.eup %1954 }
 0x812   : > { %v1066_v62 = vsel %vm570_vm4, %v1955_v61, 0.0 }
 0x813   : > { %1067 = vadd.xlane.f32.xlu1 %v1066_v62 }
 0x824   : > { %1072 = vrot.lane.b32.xlu1 %v2305_v30, %s2065_s23 }
 0x841   : > { %v1003_v63 = vpop.f32.mrb[24].mxu0 }
 0x842   : > { %v1009_v1 = vadd.f32 %v1003_v63, %v842_v27  ;;  %v1826_v2 = vpop.f32.mrb[25].mxu0 }
 0x843   : > { %v1006_v3 = vpop.f32.mrb[26].mxu0 }
 0x844   : > { %v1827_v4 = vpop.f32.mrb[27].mxu0  ;;  %v1938_v3 = vld [vmem:[%s2544_s5 + $0x70] sm:$0xff]  }
 0x845   : > { %v1939_v4 = vld [vmem:[%s2544_s5 + $0x30] sm:$0xff]  }
 0x8a0   : > { %v1068_v5 = vpop.xlane.xlu1 %1067 }
 0x8a1   : > { %1956 = vrcp.f32 %v1068_v5  ;;  %v1940_v5 = vld [vmem:[%s2544_s5 + $0x78] sm:$0xff]  }
 0x8a4   : > { %v1073_v6 = vpop.permute.xlu1 %1072 }
 0x8a5   : > { %v1078_v7 = vsel %vm586_vm3, %v1073_v6, 0  ;;  %v1941_v6 = vld [vmem:[%s2544_s5 + $0x38] sm:$0xff]  }
 0x8a6   : > { %1835 = vmatpush3.bf16.msra.mxu0 %v1078_v7  ;;  %v1212_v7 = vld [vmem:[%s2543_s4] sm:$0x3] }
 0x8a7   : > { %1267 = vmatprep.subr.bf16.mxu0 %v1916_v37 }
 0x8ab   : > { %v1957_v9 = vpop.eup %1956 }
 0x8ac   : > { %v1070_v10 = vmul.f32 %v1957_v9, %v1955_v61  ;;  %v1217_v9 = vrot.slane %v1212_v7, %v1175_v19 }
 0x8ae   : > { %v1071_v11 = vpack.c.bf16 %v1070_v10, %v1070_v10  ;;  %v1221_v10 = vrot.slane %v1212_v7, %v1195_v58 }
 0x8b0   : > { %1837 = vmatmul.mubr.msk.bf16.vlgmr.msra.gmra.mrb[28].mxu0 %vm570_vm4, %v1071_v11 }
 0x8b1   : > { %1268 = vmatpush1.bf16.msra.mxu0 %v1914_v38  ;;  %1299 = vmatprep.mubr.bf16.mxu0 %v2066_v44 }
 0x983   : > { %v1114_v30 = vpop.f32.mrb[28].mxu0 }
 0x984   : > { %v1120_v12 = vpack.c.bf16 %v1114_v30, %v1114_v30  ;;  %v1838_v13 = vpop.f32.mrb[29].mxu0 }
 0x985   : > { %v1117_v14 = vpop.f32.mrb[30].mxu0 }
 0x986   : > { %v1839_v15 = vpop.f32.mrb[31].mxu0  ;;  %1843 = vmatmul.mubr.msk.bf16.vlgmr.msra.gmra.mrb[24].mxu1 %vm523_vm2, %v1120_v12 }
 0x987   : > { %1717 = vmatpush3.bf16.msra.mxu1 %v1927_v46 }
 0x988   : > { %1718 = vmatprep.subr.bf16.mxu1 %v1928_v47 }
 0x98b   : > { %1719 = vmatpush3.bf16.msra.mxu1 %v1929_v16 }
 0x98c   : > { %1720 = vmatprep.subr.bf16.mxu1 %v1930_v22 }
 0x98f   : > { %1721 = vmatpush3.bf16.msra.mxu1 %v1931_v48 }
 0x990   : > { %1722 = vmatprep.subr.bf16.mxu1 %v1932_v49 }
 0x993   : > { %1723 = vmatpush3.bf16.msra.mxu1 %v1933_v50 }
 0x994   : > { %1724 = vmatprep.subr.bf16.mxu1 %v1934_v51 }
 0x997   : > { %1725 = vmatpush3.bf16.msra.mxu1 %v1935_v52 }
 0x998   : > { %1726 = vmatprep.subr.bf16.mxu1 %v1936_v53 }
 0x99b   : > { %1727 = vmatpush3.bf16.msra.mxu1 %v1937_v54 }
 0x99c   : > { %1728 = vmatprep.subr.bf16.mxu1 %v1938_v3 }
 0x99f   : > { %1729 = vmatpush3.bf16.msra.mxu1 %v1939_v4 }
 0x9a0   : > { %1730 = vmatprep.subr.bf16.mxu1 %v1940_v5 }
 0x9a3   : > { %1731 = vmatpush3.bf16.msra.mxu1 %v1941_v6 }
 0xa59   : > { %v1166_v23 = vpop.f32.mrb[24].mxu1 }
 0xa5a   : > { %v1172_v24 = vadd.f32 %v1166_v23, %v1009_v1  ;;  %v1844_v25 = vpop.f32.mrb[25].mxu1 }
 0xa5b   : > { %v1169_v26 = vpop.f32.mrb[26].mxu1  ;;  %v1346_v25 = vsub.s32 3, %v2384_v18 }
 0xa5c   : > { %v1177_v27 = vadd.f32 %v1176_v21, %v1172_v24  ;;  %v1845_v28 = vpop.f32.mrb[27].mxu1 }
 0xa5e   : > { %v1178_v29 = vadd.f32 %v1177_v27, %v2254_v8  ;;  %v1919_v8 = vld [vmem:[%s2542_s3 + $0x14] ss:$8 sps:$4 sm:$0xff]   ;;  %v1347_v27 = vrot.slane %v2390_v20, %v1346_v25 }
 0xa5f   : > { %1269 = vmatprep.subr.bf16.mxu0 %v1919_v8 }
 0xa60   : > { %v1179_v31 = vsel %vm329_vm1, %v1178_v29, 0.0  ;;  %1270 = vmatpush1.bf16.msra.mxu0 %v1917_v39 }
 0xa61   : > { %1180 = vadd.xlane.f32.xlu1 %v1179_v31  ;;  %1271 = vmatprep.subr.bf16.mxu0 %v1922_v40 }
 0xa64   : > { %1272 = vmatpush1.bf16.msra.mxu0 %v1920_v41 }
 0xa65   : > { %1273 = vmatprep.subr.bf16.mxu0 %v1925_v43  ;;  %v1505_v43 = vsub.s32 5, %v2384_v18 }
 0xa67   : > { %v1506_v47 = vrot.slane %v2390_v20, %v1505_v43 }
 0xa68   : > { %1274 = vmatpush1.bf16.msra.mxu0 %v1923_v42  ;;  %v1500_v42 = vsub.s32 4, %v2384_v18 }
 0xa6a   : > { %v1501_v44 = vrot.slane %v2390_v20, %v1500_v42 }
 0xaee   : > { %v1181_v32 = vpop.xlane.xlu1 %1180 }
 0xaef   : > { %v1183_v33 = vmul.f32 0.015625, %v1181_v32 }
 0xaf1   : > { %v1184_v34 = vsub.f32 %v1178_v29, %v1183_v33 }
 0xaf3   : > { %v1185_v35 = vmul.f32 %v1184_v34, %v1184_v34 }
 0xaf5   : > { %v1186_v36 = vsel %vm329_vm1, %v1185_v35, 0.0 }
 0xaf6   : > { %1187 = vadd.xlane.f32.xlu0 %v1186_v36 }
 0xb83   : > { %v1188_v55 = vpop.xlane.xlu0 %1187 }
 0xb84   : > { %v1189_v56 = vmul.f32 0.015625, %v1188_v55 }
 0xb86   : > { %v1190_v57 = vadd.f32 1e-05, %v1189_v56 }
 0xb88   : > { %1958 = vrsqrt.f32 %v1190_v57 }
 0xb92   : > { %v1959_v61 = vpop.eup %1958 }
 0xb93   : > { %v1192_v62 = vmul.f32 %v1959_v61, %v1184_v34 }
 0xb95   : > { %v1197_v63 = vmul.f32 %v1196_v60, %v1192_v62 }
 0xb97   : > { %v1202_v1 = vadd.f32 %v1201_v0, %v1197_v63 }
 0xb99   : > { %v1203_v2 = vpack.c.bf16 %v1202_v1, %v1202_v1 }
 0xb9b   : > { %1656 = vmatmul.mubr.msk.bf16.vlgmr.msra.gmra.mrb[32].mxu0 %vm329_vm1, %v1203_v2 }
 0xc6e   : > { %v1301_v11 = vpop.f32.mrb[32].mxu0 }
 0xc6f   : > { %v1302_v30 = vadd.f32 %v1301_v11, %v1217_v9  ;;  %v1303_v12 = vpop.f32.mrb[33].mxu0 }
 0xc70   : > { %v1304_v13 = vadd.f32 %v1303_v12, %v1221_v10  ;;  %v1305_v14 = vpop.f32.mrb[34].mxu0 }
 0xc71   : > { %v1308_v15 = vmax.f32 %v1302_v30, 0.0  ;;  %v1306_v17 = vpop.f32.mrb[35].mxu0 }
 0xc72   : > { %v1309_v21 = vmax.f32 %v1304_v13, 0.0 }
 0xc73   : > { %v1310_v24 = vpack.c.bf16 %v1308_v15, %v1308_v15 }
 0xc74   : > { %v1311_v23 = vpack.c.bf16 %v1309_v21, %v1309_v21 }
 0xc76   : > { %1476 = vmatprep.mubr.bf16.mxu1 %v1311_v23 }
 0xc77   : > { %1477 = vmatmul.mubr.bf16.vlgmr.msra.gmra.mrb[28].mxu1 %v1310_v24 }
 0xd4a   : > { %v1732_v26 = vpop.f32.mrb[28].mxu1 }
 0xd4b   : > { %v1733_v28 = vpop.f32.mrb[29].mxu1 }
 0xd4c   : > { %v1734_v19 = vadd.f32 %v1733_v28, %v1732_v26  ;;  %v1735_v29 = vpop.f32.mrb[30].mxu1 }
 0xd4d   : > { %v1736_v31 = vpop.f32.mrb[31].mxu1 }
 0xd4e   : > { %v1479_v32 = vadd.f32 %v1734_v19, %v1347_v27 }
 0xd50   : > { %v1484_v33 = vadd.f32 %v1479_v32, %v1202_v1 }
 0xd52   : > { %v1485_v34 = vsel %vm329_vm1, %v1484_v33, 0.0 }
 0xd53   : > { %1486 = vadd.xlane.f32.xlu0 %v1485_v34 }
 0xde0   : > { %v1487_v35 = vpop.xlane.xlu0 %1486 }
 0xde1   : > { %v1488_v36 = vmul.f32 0.015625, %v1487_v35 }
 0xde3   : > { %v1489_v37 = vsub.f32 %v1484_v33, %v1488_v36 }
 0xde5   : > { %v1490_v38 = vmul.f32 %v1489_v37, %v1489_v37 }
 0xde7   : > { %v1491_v8 = vsel %vm329_vm1, %v1490_v38, 0.0 }
 0xde8   : > { %1492 = vadd.xlane.f32.xlu0 %v1491_v8 }
 0xe75   : > { %v1493_v39 = vpop.xlane.xlu0 %1492 }
 0xe76   : > { %v1494_v40 = vmul.f32 0.015625, %v1493_v39 }
 0xe78   : > { %v1495_v41 = vadd.f32 1e-05, %v1494_v40 }
 0xe7a   : > { %1960 = vrsqrt.f32 %v1495_v41 }
 0xe84   : > { %v1961_v45 = vpop.eup %1960 }
 0xe85   : > { %v1497_v46 = vmul.f32 %v1961_v45, %v1489_v37 }
 0xe87   : > { %v1502_v16 = vmul.f32 %v1501_v44, %v1497_v46 }
 0xe89   : > { %v1507_v22 = vadd.f32 %v1506_v47, %v1502_v16 }
 0xe8b   : > { %1508 = vst.msk [vmem:[%s293_s18] sm:$0xff] %vm329_vm1, %v1507_v22 }
 0xe8c   : > { %2005 = shalt.err (!%p2002_p4)
}
 0xe8d   : > { %s2006_s8 = scalar_lea.hbm %s2494_s21, 128  ;;  %s2010_s17 = scalar_lea.hbm %s2546_s7, 256 }
 0xe8e   : > { %p2007_p5 = scmp.ne.s32.totalorder %s2494_s21, %s2006_s8  ;;  %p2011_p0 = scmp.lt.u32.totalorder %s2494_s21, %s2546_s7 }
 0xe8f   : > { %p2012_p1 = scmp.lt.u32.totalorder %s2010_s17, %s2006_s8  ;;  %p2014_p6 = scmp.lt.u32.totalorder %s2006_s8, %s2494_s21 }
 0xe90   : > { %p2008_p8 = pnand %p2007_p5, %p2555_p11 }
 0xe91   : > { %p2013_p3 = por %p2012_p1, %p2011_p0 }
 0xe92   : > { %p2009_p9 = pneg %p2008_p8 }
 0xe93   : > { %p2015_p12 = por %p2014_p6, %p2013_p3 }
 0xe95   : > { %p2016_p13 = pnand %p2015_p12, %p2009_p9 }
 0xe97   : > { %2019 = shalt.err (!%p2016_p13)
}
 0xe98   : > { %1848 = dma.vmem_to_hbm [thread:$0]  (%p2555_p11), %s2496_s15, 128, %s2494_s21, %s1510_s9  }
 0xe99 PF: > { %s1535_s23 = sand.u32 1, %s2046_s24   ;;  %p2556_p7 = scmp.ne.s32.totalorder %s2551_s14, 0 }
 0xe9a   : > { %p2557_p10 = scmp.ge.s32.totalorder %s2058_s27, 2  ;;  %s1536_s19 = scalar_lea.sflag [#allocation4], %s1535_s23 }
 0xe9c   : > { %p1855_p2 = pnand %p2557_p10, %p2556_p7 }
 0xe9e   : > { %2041 = dma.done.wait (!%p1855_p2), %s1536_s19, 128  }
 0xe9f   : > { %2043 = vsyncadd (!%p1855_p2), %s1536_s19, 4294967168  ;;  %p20_p4 = scmp.ge.s32.totalorder %s2133_s30, 4   ;;  %s2558_s24 = smov %s2050_s25 }
 0xea0   : > { %s2559_s25 = smov %s2054_s26  ;;  %s2560_s26 = smov %s2145_s10 }
 0xea1   : > { %s2561_s27 = smov %s2133_s30  ;;  %22 = sbr.rel (!%p20_p4) target bundleno = 5 (0x5), region = 95 }
 0xea8   :  { %1541 = vsyncpa [#allocation3], 1 }
 0xea9   :  { %1543 = vsyncpa [#allocation3 + $0x1], 1 }
 0xeaa   :  { %1544 = vsyncpa [#allocation4], 1 }
 0xeab   :  { %1546 = vsyncpa [#allocation4 + $0x1], 1 }

// kernel: tpu_custom_call.1
= control target key start
LH: loop header
LB: loop body
LE: loop exit
PB: predicated region body
PF: predicated region fallthrough
CT: control target
= control target key end

     0   :  { %12 = vsyncpa [#allocation3], 0  ;;  %s2539_s0 = inlined_call_operand.hbm [shape: f32[16,64], index: 0, kind: input, shape index: {}]   ;;  %s2540_s1 = inlined_call_operand.vmem [shape: bf16[3,64,64], index: 1, kind: input, shape index: {}]   ;;  %s2541_s2 = inlined_call_operand.vmem [shape: bf16[64,64], index: 2, kind: input, shape index: {}]   ;;  %s2542_s3 = inlined_call_operand.vmem [shape: bf16[64,256], index: 3, kind: input, shape index: {}]   ;;  %s2543_s4 = inlined_call_operand.vmem [shape: f32[1,256], index: 4, kind: input, shape index: {}]   ;;  %s2544_s5 = inlined_call_operand.vmem [shape: bf16[256,64], index: 5, kind: input, shape index: {}]   ;;  %s2545_s6 = inlined_call_operand.vmem [shape: f32[8,64], index: 6, kind: input, shape index: {}]   ;;  %s2546_s7 = inlined_call_operand.hbm [shape: f32[16,64], index: 7, kind: output, shape index: {}]  }
   0x1   :  { %14 = vsyncpa [#allocation3 + $0x1], 0 }
   0x2   :  { %15 = vsyncpa [#allocation4], 0 }
   0x3   :  { %17 = vsyncpa [#allocation4 + $0x1], 0  ;;  %s2108_s24 = smov 0   ;;  %s2110_s25 = smov 0  }
   0x4   :  { %s2112_s26 = smov 0   ;;  %s2114_s27 = smov 0  }
   0x5 LB: > { %s2129_s28 = sadd.s32 4294967295, %s2058_s27   ;;  %s1593_s29 = sadd.s32 4294967294, %s2058_s27   ;;  %s2058_s27 = sphi %s2114_s27, %s2561_s27   ;;  %s2054_s26 = sphi %s2112_s26, %s2560_s26   ;;  %s2050_s25 = sphi %s2110_s25, %s2559_s25   ;;  %s2046_s24 = sphi %s2108_s24, %s2558_s24  }
   0x6   : > { %s2133_s30 = sadd.s32 1, %s2058_s27   ;;  %s30_s8 = sadd.s32 1, %s2054_s26 }
   0x7   : > { %s27_s9 = ssub.s32 %s2058_s27, %s2133_s30  ;;  %p37_p0 = scmp.ne.s32.totalorder %s2054_s26, %s2050_s25 }
   0x8   : > { %p28_p1 = scmp.eq.s32.totalorder %s27_s9, 0  ;;  %p38_p2 = scmp.eq.s32.totalorder %s2058_s27, 0 }
   0x9   : > { %p43_p3 = scmp.ne.s32.totalorder %s2050_s25, %s2046_s24  ;;  %p44_p4 = scmp.eq.s32.totalorder %s2129_s28, 0 }
   0xa   : > { %s2145_s10 = scalar_select %p28_p1, %s2054_s26, %s30_s8  }
   0xb   : > { %p2147_p5 = por %p38_p2, %p37_p0  ;;  %p2151_p6 = por %p44_p4, %p43_p3 }
   0xc   : > { %p193_p7 = scmp.eq.s32.totalorder %s2129_s28, 1  ;;  %p199_p8 = scmp.eq.s32.totalorder %s1593_s29, 1 }
   0xd   : > { %p1858_p10 = scmp.lt.s32.totalorder %s2058_s27, 2  ;;  %s237_s15 = sand.u32 1, %s2054_s26  }
   0xe   : > { %p2158_p11 = por %p193_p7, %p37_p0  ;;  %p2162_p12 = por %p199_p8, %p43_p3 }
   0xf   : > { %s1597_s16 = sshll.u32 %s2058_s27, 7  ;;  %s1596_s17 = sshll.u32 %s237_s15, 3 }
  0x10   : > { %s2550_s13 = scalar_select %p2158_p11, 1, 0 }
  0x11   : > { %s2551_s14 = scalar_select %p2162_p12, 1, 0 }
  0x12   : > { %s2171_s20 = scalar_lea.hbm %s2539_s0, %s1597_s16  ;;  %s241_s21 = scalar_lea.vmem [#allocation2], %s1596_s17 }
  0x13   : > { %s248_s22 = sshll.u32 %s241_s21, 4  ;;  %p2175_p13 = pnand %p1858_p10, %p2147_p5  ;;  %s2179_s22 = int_to_ptr.vmem [resolvable:$true] %s248_s22 }
  0x14   : > { %s238_s29 = scalar_lea.sflag [#allocation3], %s237_s15  ;;  %s1962_s8 = scalar_lea.hbm %s2171_s20, 128 }
  0x15   : > { %p1963_p2 = scmp.ne.s32.totalorder %s2171_s20, %s1962_s8  ;;  %p1964_p3 = pneg %p2175_p13 }
  0x16   : > { %s1967_s16 = scalar_lea.hbm %s2539_s0, 256  ;;  %p1968_p5 = scmp.lt.u32.totalorder %s2171_s20, %s2539_s0 }
  0x17   : > { %p1965_p4 = pnand %p1964_p3, %p1963_p2  ;;  %p1969_p8 = scmp.lt.u32.totalorder %s1967_s16, %s1962_s8 }
  0x18   : > { %p1971_p9 = scmp.lt.u32.totalorder %s1962_s8, %s2171_s20 }
  0x19   : > { %p1966_p7 = pneg %p1965_p4  ;;  %p1970_p10 = por %p1969_p8, %p1968_p5 }
  0x1b   : > { %p1972_p0 = por %p1971_p9, %p1970_p10 }
  0x1d   : > { %p1973_p1 = pnand %p1972_p0, %p1966_p7 }
  0x1f   : > { %1976 = shalt.err (!%p1973_p1)
}
  0x20   : > { %s1977_s15 = scalar_lea.vmem %s2179_s22, 128  ;;  %s2060_s19 = smov [#allocation2]  }
  0x21   : > { %p1978_p2 = scmp.ne.s32.totalorder %s2179_s22, %s1977_s15  ;;  %s1982_s21 = sshll.u32 %s2060_s19, 4  ;;  %s1983_s21 = int_to_ptr.vmem [resolvable:$false] %s1982_s21 }
  0x22   : > { %s1984_s9 = scalar_lea.vmem %s1983_s21, 256  ;;  %p1985_p11 = scmp.lt.s32.totalorder %s2179_s22, %s1983_s21 }
  0x23   : > { %p1980_p4 = pnand %p1978_p2, %p1964_p3  ;;  %p1986_p5 = scmp.lt.s32.totalorder %s1984_s9, %s1977_s15 }
  0x25   : > { %p1981_p12 = pneg %p1980_p4  ;;  %p1987_p8 = por %p1986_p5, %p1985_p11 }
  0x27   : > { %p1988_p9 = pnand %p1987_p8, %p1981_p12 }
  0x29   : > { %1991 = shalt.err (!%p1988_p9)
}
  0x2a   : > { %1853 = dma.hbm_to_vmem [thread:$0]  (!%p2175_p13), %s2171_s20, 128, %s2179_s22, %s238_s29  }
  0x2b   : > { %p2553_p0 = scmp.lt.s32.totalorder %s2058_s27, 3  ;;  %p2554_p1 = scmp.ge.s32.totalorder %s2058_s27, 1 }
  0x2d   : > { %p254_p3 = pnand %p2554_p1, %p2553_p0 }
  0x2e   : > { %s2213_s8 = sand.u32 (!%p254_p3), 1, %s2050_s25  }
  0x2f   : > { %257 = sbr.rel (%p254_p3) target bundleno = 3737 (0xe99), region = 48  ;;  %s1599_s11 = sshll.u32 (!%p254_p3), %s2213_s8, 3 }
  0x30   : > { %s260_s16 = scalar_lea.sflag (!%p254_p3), [#allocation3], %s2213_s8  ;;  %s263_s23 = scalar_lea.vmem (!%p254_p3), [#allocation2], %s1599_s11 }
  0x36   : > { %2037 = dma.done.wait (%p2151_p6), %s260_s16, 128  }
  0x37   : > { %2039 = vsyncadd (%p2151_p6), %s260_s16, 4294967168  ;;  %v2061_v0 = vmov 0.0   ;;  %vm2062_vm0 = vmmov 0   ;;  %v1898_v1 = vld [vmem:[%s2540_s1 + $0x20] sm:$0xff]   ;;  %v1899_v2 = vld [vmem:[%s2540_s1 + $0x28] sm:$0xff]   ;;  %vm329_vm1 = vcmask 523264  }
  0x38   : > { %1750 = vmatprep.subr.bf16.mxu1 %v2061_v0  ;;  %1738 = vmatprep.subr.bf16.mxu0 %v2061_v0  ;;  %v1900_v3 = vld [vmem:[%s2540_s1] sm:$0xff]   ;;  %v1902_v4 = vld [vmem:[%s2540_s1 + $0x8] sm:$0xff]   ;;  %v1901_v5 = vld [vmem:[%s2540_s1 + $0x30] sm:$0xff]   ;;  %vm523_vm2 = vcmask 130048   ;;  %s2063_s22 = smov 112   ;;  %vm586_vm3 = vcmask 1043456  }
  0x39   : > { %1758 = vmatprep.mubr.msk.bf16.mxu1 %vm2062_vm0, %v2061_v0  ;;  %1746 = vmatprep.mubr.msk.bf16.mxu0 %vm2062_vm0, %v2061_v0  ;;  %v1904_v6 = vld [vmem:[%s2540_s1 + $0x10] sm:$0xff]   ;;  %v1903_v7 = vld [vmem:[%s2540_s1 + $0x38] sm:$0xff]   ;;  %v2254_v8 = vld [vmem:[%s263_s23] sm:$0xff]  ;;  %vm570_vm4 = vcmask 64512   ;;  %s2064_s29 = smov 96   ;;  %s2065_s23 = smov 80  }
  0x3a   : > { %1751 = vmatpush3.bf16.msra.mxu1 %v1898_v1  ;;  %1739 = vmatpush3.bf16.msra.mxu0 %v1900_v3  ;;  %v1905_v9 = vld [vmem:[%s2540_s1 + $0x18] sm:$0xff]   ;;  %v296_v10 = vpack.c.bf16 %v2254_v8, %v2254_v8  ;;  %v1906_v11 = vld [vmem:[%s2540_s1 + $0x40] sm:$0xff]   ;;  %v1907_v12 = vld [vmem:[%s2540_s1 + $0x48] sm:$0xff]   ;;  %s1674_s12 = sshll.u32 %s2129_s28, 7  ;;  %s293_s18 = scalar_lea.vmem [#allocation5], %s1599_s11 }
  0x3b   : > { %1752 = vmatprep.subr.bf16.mxu1 %v2061_v0  ;;  %1740 = vmatprep.subr.bf16.mxu0 %v2061_v0  ;;  %v1908_v13 = vld [vmem:[%s2540_s1 + $0x50] sm:$0xff]   ;;  %v1909_v14 = vld [vmem:[%s2540_s1 + $0x58] sm:$0xff]   ;;  %v1911_v59 = vld [vmem:[%s2541_s2 + $0x8] sm:$0xff]   ;;  %s1523_s15 = sshll.u32 %s293_s18, 4  ;;  %s2494_s21 = scalar_lea.hbm %s2546_s7, %s1674_s12  ;;  %s2496_s15 = int_to_ptr.vmem [resolvable:$true] %s1523_s15 }
  0x3c   : > { %s1510_s9 = scalar_lea.sflag [#allocation4], %s2213_s8  ;;  %s1992_s16 = scalar_lea.vmem %s2496_s15, 128 }
  0x3d   : > { %p1993_p6 = scmp.ne.s32.totalorder %s2496_s15, %s1992_s16  ;;  %p2555_p11 = scmp.ne.s32.totalorder %s2550_s13, 0 }
  0x3e   : > { %1753 = vmatpush3.bf16.msra.mxu1 %v1899_v2  ;;  %1741 = vmatpush3.bf16.msra.mxu0 %v1902_v4  ;;  %v1910_v2 = vld [vmem:[%s2541_s2] sm:$0xff]   ;;  %s2067_s28 = smov [#allocation5]  }
  0x3f   : > { %1754 = vmatprep.subr.bf16.mxu1 %v2061_v0  ;;  %1742 = vmatprep.subr.bf16.mxu0 %v2061_v0  ;;  %p1994_p12 = pnand %p1993_p6, %p2555_p11  ;;  %s1996_s11 = sshll.u32 %s2067_s28, 4  ;;  %s1997_s11 = int_to_ptr.vmem [resolvable:$false] %s1996_s11 }
  0x40   : > { %s1998_s20 = scalar_lea.vmem %s1997_s11, 256  ;;  %p1999_p7 = scmp.lt.s32.totalorder %s2496_s15, %s1997_s11 }
  0x41   : > { %p1995_p13 = pneg %p1994_p12  ;;  %p2000_p10 = scmp.lt.s32.totalorder %s1998_s20, %s1992_s16 }
  0x42   : > { %1755 = vmatpush3.bf16.msra.mxu1 %v1901_v5  ;;  %1743 = vmatpush3.bf16.msra.mxu0 %v1904_v6 }
  0x43   : > { %1756 = vmatprep.subr.bf16.mxu1 %v2061_v0  ;;  %1744 = vmatprep.subr.bf16.mxu0 %v2061_v0  ;;  %p2001_p2 = por %p2000_p10, %p1999_p7 }
  0x45   : > { %p2002_p4 = pnand %p2001_p2, %p1995_p13 }
  0x46   : > { %1757 = vmatpush3.bf16.msra.mxu1 %v1903_v7  ;;  %1745 = vmatpush3.bf16.msra.mxu0 %v1905_v9 }
  0x47   : > { %1780 = vmatprep.subr.bf16.mxu1 %v2061_v0  ;;  %1762 = vmatprep.subr.bf16.mxu0 %v2061_v0 }
  0x49   : > { %1759 = vmatmul.mubr.msk.bf16.vlgmr.msra.gmra.mrb[0].mxu1 %vm329_vm1, %v296_v10  ;;  %1747 = vmatmul.mubr.msk.bf16.vlgmr.msra.gmra.mrb[0].mxu0 %vm329_vm1, %v296_v10 }
  0x4a   : > { %1782 = vmatprep.mubr.msk.bf16.mxu1 %vm2062_vm0, %v2061_v0  ;;  %1763 = vmatpush3.bf16.msra.mxu0 %v1906_v11 }
  0x4b   : > { %1770 = vmatprep.mubr.msk.bf16.mxu0 %vm2062_vm0, %v2061_v0  ;;  %1764 = vmatprep.subr.bf16.mxu0 %v2061_v0 }
  0x4e   : > { %1765 = vmatpush3.bf16.msra.mxu0 %v1907_v12 }
  0x4f   : > { %1766 = vmatprep.subr.bf16.mxu0 %v2061_v0 }
  0x52   : > { %1767 = vmatpush3.bf16.msra.mxu0 %v1908_v13 }
  0x53   : > { %1768 = vmatprep.subr.bf16.mxu0 %v2061_v0 }
  0x56   : > { %1769 = vmatpush3.bf16.msra.mxu0 %v1909_v14 }
  0x57   : > { %1774 = vmatprep.subr.bf16.mxu0 %v2061_v0 }
  0x59   : > { %1771 = vmatmul.mubr.msk.bf16.vlgmr.msra.gmra.mrb[4].mxu0 %vm329_vm1, %v296_v10 }
  0x5a   : > { %1776 = vmatprep.mubr.msk.bf16.mxu0 %vm2062_vm0, %v2061_v0 }
 0x11c   : > { %v440_v15 = vpop.f32.mrb[0].mxu1  ;;  %v367_v19 = vpop.f32.mrb[0].mxu0 }
 0x11d   : > { %v2290_v16 = vpack.c.bf16 %v440_v15, %v440_v15  ;;  %v1760_v17 = vpop.f32.mrb[1].mxu1  ;;  %v2296_v22 = vpack.c.bf16 %v367_v19, %v367_v19  ;;  %v1748_v23 = vpop.f32.mrb[1].mxu0 }
 0x11e   : > { %v443_v18 = vpop.f32.mrb[2].mxu1  ;;  %v370_v24 = vpop.f32.mrb[2].mxu0 }
 0x11f   : > { %637 = vrot.lane.b32.xlu0 %v2290_v16, %s2063_s22  ;;  %v1761_v20 = vpop.f32.mrb[3].mxu1  ;;  %v528_v21 = vsel %vm523_vm2, %v2290_v16, 0  ;;  %v1749_v25 = vpop.f32.mrb[3].mxu0 }
 0x120   : > { %1775 = vmatpush3.bf16.xpose.msra.mxu0 %v528_v21 }
 0x121   : > { %1786 = vmatprep.subr.bf16.mxu0 %v2061_v0 }
 0x123   : > { %634 = vrot.lane.b32.xlu0 %v2296_v22, %s2063_s22 }
 0x127   : > { %1777 = vmatmul.mubr.msk.bf16.vlgmr.msra.gmra.mrb[8].mxu0 %vm523_vm2, %v2296_v22 }
 0x128   : > { %1788 = vmatprep.mubr.msk.bf16.mxu0 %vm2062_vm0, %v2061_v0 }
 0x12c   : > { %v513_v26 = vpop.f32.mrb[4].mxu0 }
 0x12d   : > { %v1772_v27 = vpop.f32.mrb[5].mxu0  ;;  %v2305_v30 = vpack.c.bf16 %v513_v26, %v513_v26 }
 0x12e   : > { %v516_v28 = vpop.f32.mrb[6].mxu0 }
 0x12f   : > { %v1773_v29 = vpop.f32.mrb[7].mxu0  ;;  %v588_v31 = vsel %vm586_vm3, %v2305_v30, 0 }
 0x130   : > { %1781 = vmatpush3.bf16.msra.mxu1 %v588_v31 }
 0x131   : > { %1792 = vmatprep.subr.bf16.mxu1 %v2061_v0 }
 0x191   : > { %v638_v32 = vpop.permute.xlu0 %637 }
 0x192   : > { %v643_v33 = vsel %vm523_vm2, %v638_v32, 0 }
 0x193   : > { %1787 = vmatpush3.bf16.xpose.msra.mxu0 %v643_v33 }
 0x194   : > { %1798 = vmatprep.subr.bf16.mxu0 %v2061_v0 }
 0x195   : > { %v635_v34 = vpop.permute.xlu0 %634 }
 0x19a   : > { %1789 = vmatmul.mubr.msk.bf16.vlgmr.msra.gmra.mrb[12].mxu0 %vm523_vm2, %v635_v34 }
 0x19b   : > { %1800 = vmatprep.mubr.msk.bf16.mxu0 %vm2062_vm0, %v2061_v0  ;;  %1799 = vmatpush3.bf16.msra.mxu0 %v1911_v59 }
 0x19c   : > { %1810 = vmatprep.subr.bf16.mxu0 %v2061_v0 }
 0x1fa   : > { %v564_v35 = vpop.f32.mrb[8].mxu0 }
 0x1fb   : > { %v1778_v36 = vpop.f32.mrb[9].mxu0  ;;  %v571_v37 = vsel %vm570_vm4, %v564_v35, -inf }
 0x1fc   : > { %572 = vmax.xlane.f32.xlu1 %v571_v37  ;;  %v567_v38 = vpop.f32.mrb[10].mxu0 }
 0x1fd   : > { %v1779_v39 = vpop.f32.mrb[11].mxu0 }
 0x26d   : > { %v679_v40 = vpop.f32.mrb[12].mxu0 }
 0x26e   : > { %v1790_v41 = vpop.f32.mrb[13].mxu0  ;;  %v685_v42 = vsel %vm570_vm4, %v679_v40, -inf }
 0x26f   : > { %686 = vmax.xlane.f32.xlu1 %v685_v42  ;;  %v682_v43 = vpop.f32.mrb[14].mxu0 }
 0x270   : > { %v1791_v44 = vpop.f32.mrb[15].mxu0 }
 0x289   : > { %v573_v45 = vpop.xlane.xlu1 %572 }
 0x28a   : > { %v574_v46 = vsub.f32 %v564_v35, %v573_v45 }
 0x28c   : > { %v575_v47 = vmul.f32 1.442695, %v574_v46 }
 0x28e   : > { %1942 = vpow2.f32 %v575_v47 }
 0x298   : > { %v1943_v48 = vpop.eup %1942 }
 0x299   : > { %v577_v49 = vsel %vm570_vm4, %v1943_v48, 0.0 }
 0x29a   : > { %578 = vadd.xlane.f32.xlu0 %v577_v49 }
 0x2b0   : > { %909 = vrot.lane.b32.xlu0 %v2305_v30, %s2064_s29 }
 0x2fc   : > { %v687_v50 = vpop.xlane.xlu1 %686 }
 0x2fd   : > { %v688_v51 = vsub.f32 %v679_v40, %v687_v50 }
 0x2ff   : > { %v689_v52 = vmul.f32 1.442695, %v688_v51 }
 0x301   : > { %1944 = vpow2.f32 %v689_v52 }
 0x30b   : > { %v1945_v53 = vpop.eup %1944 }
 0x30c   : > { %v691_v54 = vsel %vm570_vm4, %v1945_v53, 0.0 }
 0x30d   : > { %692 = vadd.xlane.f32.xlu1 %v691_v54 }
 0x31e   : > { %698 = vrot.lane.b32.xlu1 %v2305_v30, %s2063_s22 }
 0x322   : > { %849 = vrot.lane.b32.xlu1 %v2290_v16, %s2064_s29 }
 0x326   : > { %847 = vrot.lane.b32.xlu1 %v2296_v22, %s2064_s29 }
 0x327   : > { %v579_v55 = vpop.xlane.xlu0 %578 }
 0x328   : > { %1946 = vrcp.f32 %v579_v55 }
 0x32b   : > { %v910_v4 = vpop.permute.xlu0 %909 }
 0x32c   : > { %v915_v10 = vsel %vm586_vm3, %v910_v4, 0 }
 0x332   : > { %v1947_v56 = vpop.eup %1946 }
 0x333   : > { %v581_v57 = vmul.f32 %v1947_v56, %v1943_v48 }
 0x335   : > { %v582_v58 = vpack.c.bf16 %v581_v57, %v581_v57 }
 0x337   : > { %1783 = vmatmul.mubr.msk.bf16.vlgmr.msra.gmra.mrb[4].mxu1 %vm570_vm4, %v582_v58 }
 0x338   : > { %1794 = vmatprep.mubr.msk.bf16.mxu1 %vm2062_vm0, %v2061_v0 }
 0x39a   : > { %v693_v60 = vpop.xlane.xlu1 %692 }
 0x39b   : > { %1948 = vrcp.f32 %v693_v60 }
 0x39e   : > { %v699_v61 = vpop.permute.xlu1 %698 }
 0x39f   : > { %v704_v62 = vsel %vm586_vm3, %v699_v61, 0 }
 0x3a0   : > { %1793 = vmatpush3.bf16.msra.mxu1 %v704_v62 }
 0x3a1   : > { %1804 = vmatprep.subr.bf16.mxu1 %v2061_v0 }
 0x3a2   : > { %v850_v12 = vpop.permute.xlu1 %849 }
 0x3a3   : > { %v855_v18 = vsel %vm523_vm2, %v850_v12, 0 }
 0x3a5   : > { %v1949_v63 = vpop.eup %1948 }
 0x3a6   : > { %v695_v1 = vmul.f32 %v1949_v63, %v1945_v53  ;;  %v848_v20 = vpop.permute.xlu1 %847 }
 0x3a8   : > { %v696_v3 = vpack.c.bf16 %v695_v1, %v695_v1 }
 0x3aa   : > { %1795 = vmatmul.mubr.msk.bf16.vlgmr.msra.gmra.mrb[8].mxu1 %vm570_vm4, %v696_v3 }
 0x3ab   : > { %1805 = vmatpush3.bf16.msra.mxu1 %v1910_v2  ;;  %1806 = vmatprep.mubr.msk.bf16.mxu1 %vm2062_vm0, %v2061_v0 }
 0x3ac   : > { %1816 = vmatprep.subr.bf16.mxu1 %v2061_v0 }
 0x40a   : > { %v624_v5 = vpop.f32.mrb[4].mxu1 }
 0x40b   : > { %v630_v6 = vpack.c.bf16 %v624_v5, %v624_v5  ;;  %v1784_v7 = vpop.f32.mrb[5].mxu1 }
 0x40c   : > { %v627_v9 = vpop.f32.mrb[6].mxu1 }
 0x40d   : > { %v1785_v11 = vpop.f32.mrb[7].mxu1  ;;  %1807 = vmatmul.mubr.msk.bf16.vlgmr.msra.gmra.mrb[12].mxu1 %vm523_vm2, %v630_v6 }
 0x40e   : > { %1817 = vmatpush3.bf16.msra.mxu1 %v915_v10  ;;  %1818 = vmatprep.mubr.msk.bf16.mxu1 %vm2062_vm0, %v2061_v0 }
 0x40f   : > { %1828 = vmatprep.subr.bf16.mxu1 %v2061_v0 }
 0x47d   : > { %v740_v13 = vpop.f32.mrb[8].mxu1 }
 0x47e   : > { %v746_v14 = vpack.c.bf16 %v740_v13, %v740_v13  ;;  %v1796_v15 = vpop.f32.mrb[9].mxu1 }
 0x47f   : > { %v743_v17 = vpop.f32.mrb[10].mxu1 }
 0x480   : > { %v1797_v19 = vpop.f32.mrb[11].mxu1  ;;  %1801 = vmatmul.mubr.msk.bf16.vlgmr.msra.gmra.mrb[16].mxu0 %vm523_vm2, %v746_v14  ;;  %v1173_v17 = vlaneseq }
 0x481   : > { %1811 = vmatpush3.bf16.xpose.msra.mxu0 %v855_v18  ;;  %1812 = vmatprep.mubr.msk.bf16.mxu0 %vm2062_vm0, %v2061_v0 }
 0x482   : > { %1822 = vmatprep.subr.bf16.mxu0 %v2061_v0  ;;  %v2384_v18 = vshrl.u32 %v1173_v17, 7 }
 0x484   : > { %v1175_v19 = vsub.s32 0, %v2384_v18 }
 0x488   : > { %1813 = vmatmul.mubr.msk.bf16.vlgmr.msra.gmra.mrb[20].mxu0 %vm523_vm2, %v848_v20  ;;  %v2390_v20 = vld [vmem:[%s2545_s6] sm:$0xff] }
 0x489   : > { %1824 = vmatprep.mubr.msk.bf16.mxu0 %vm2062_vm0, %v2061_v0 }
 0x4e0   : > { %v841_v21 = vpop.f32.mrb[12].mxu1 }
 0x4e1   : > { %v1808_v23 = vpop.f32.mrb[13].mxu1 }
 0x4e2   : > { %v844_v24 = vpop.f32.mrb[14].mxu1 }
 0x4e3   : > { %v1809_v25 = vpop.f32.mrb[15].mxu1 }
 0x553   : > { %v792_v26 = vpop.f32.mrb[16].mxu0 }
 0x554   : > { %v842_v27 = vadd.f32 %v841_v21, %v792_v26  ;;  %v1802_v28 = vpop.f32.mrb[17].mxu0  ;;  %v1176_v21 = vrot.slane %v2390_v20, %v1175_v19 }
 0x555   : > { %v795_v29 = vpop.f32.mrb[18].mxu0 }
 0x556   : > { %v1803_v31 = vpop.f32.mrb[19].mxu0 }
 0x55b   : > { %v891_v32 = vpop.f32.mrb[20].mxu0 }
 0x55c   : > { %v1814_v33 = vpop.f32.mrb[21].mxu0  ;;  %v897_v34 = vsel %vm570_vm4, %v891_v32, -inf }
 0x55d   : > { %898 = vmax.xlane.f32.xlu1 %v897_v34  ;;  %v894_v35 = vpop.f32.mrb[22].mxu0 }
 0x55e   : > { %v1815_v36 = vpop.f32.mrb[23].mxu0 }
 0x5ea   : > { %v899_v37 = vpop.xlane.xlu1 %898 }
 0x5eb   : > { %v900_v38 = vsub.f32 %v891_v32, %v899_v37  ;;  %v1916_v37 = vld [vmem:[%s2542_s3 + $0x4] ss:$8 sps:$4 sm:$0xff]  }
 0x5ed   : > { %v901_v39 = vmul.f32 1.442695, %v900_v38  ;;  %v1914_v38 = vld [vmem:[%s2542_s3] ss:$8 sps:$4 sm:$0xff]  }
 0x5ef   : > { %1950 = vpow2.f32 %v901_v39  ;;  %v1917_v39 = vld [vmem:[%s2542_s3 + $0x10] ss:$8 sps:$4 sm:$0xff]  }
 0x5f9   : > { %v1951_v40 = vpop.eup %1950 }
 0x5fa   : > { %v903_v41 = vsel %vm570_vm4, %v1951_v40, 0.0 }
 0x5fb   : > { %904 = vadd.xlane.f32.xlu0 %v903_v41  ;;  %v1920_v41 = vld [vmem:[%s2542_s3 + $0x20] ss:$8 sps:$4 sm:$0xff]  }
 0x611   : > { %1012 = vrot.lane.b32.xlu0 %v2290_v16, %s2065_s23 }
 0x615   : > { %1010 = vrot.lane.b32.xlu0 %v2296_v22, %s2065_s23  ;;  %v1912_v22 = vld [vmem:[%s2541_s2 + $0x10] sm:$0xff]  }
 0x616   : > { %1823 = vmatpush3.bf16.msra.mxu0 %v1912_v22  ;;  %v1930_v22 = vld [vmem:[%s2544_s5 + $0x50] sm:$0xff]  }
 0x617   : > { %1834 = vmatprep.subr.bf16.mxu0 %v2061_v0 }
 0x688   : > { %v905_v42 = vpop.xlane.xlu0 %904 }
 0x689   : > { %1952 = vrcp.f32 %v905_v42  ;;  %v1923_v42 = vld [vmem:[%s2542_s3 + $0x30] ss:$8 sps:$4 sm:$0xff]  }
 0x68c   : > { %v1013_v45 = vpop.permute.xlu0 %1012 }
 0x68d   : > { %v1018_v47 = vsel %vm523_vm2, %v1013_v45, 0  ;;  %v1926_v45 = vld [vmem:[%s2544_s5 + $0x40] sm:$0xff]  }
 0x690   : > { %v1011_v16 = vpop.permute.xlu0 %1010 }
 0x693   : > { %v1953_v43 = vpop.eup %1952 }
 0x694   : > { %v907_v44 = vmul.f32 %v1953_v43, %v1951_v40  ;;  %v1922_v40 = vld [vmem:[%s2542_s3 + $0x24] ss:$8 sps:$4 sm:$0xff]   ;;  %v1925_v43 = vld [vmem:[%s2542_s3 + $0x34] ss:$8 sps:$4 sm:$0xff]  }
 0x696   : > { %v908_v46 = vpack.c.bf16 %v907_v44, %v907_v44  ;;  %v2066_v44 = vmov 0  }
 0x698   : > { %1819 = vmatmul.mubr.msk.bf16.vlgmr.msra.gmra.mrb[16].mxu1 %vm570_vm4, %v908_v46  ;;  %v1927_v46 = vld [vmem:[%s2544_s5] sm:$0xff]  }
 0x699   : > { %1829 = vmatpush3.bf16.xpose.msra.mxu1 %v1018_v47  ;;  %1830 = vmatprep.mubr.msk.bf16.mxu1 %vm2062_vm0, %v2061_v0  ;;  %v1928_v47 = vld [vmem:[%s2544_s5 + $0x48] sm:$0xff]  }
 0x69a   : > { %1840 = vmatprep.subr.bf16.mxu1 %v2061_v0 }
 0x6a0   : > { %1831 = vmatmul.mubr.msk.bf16.vlgmr.msra.gmra.mrb[20].mxu1 %vm523_vm2, %v1011_v16  ;;  %v1929_v16 = vld [vmem:[%s2544_s5 + $0x8] sm:$0xff]  }
 0x6a1   : > { %1842 = vmatprep.mubr.msk.bf16.mxu1 %vm2062_vm0, %v2061_v0 }
 0x76b   : > { %v951_v48 = vpop.f32.mrb[16].mxu1 }
 0x76c   : > { %v957_v49 = vpack.c.bf16 %v951_v48, %v951_v48  ;;  %v1820_v50 = vpop.f32.mrb[17].mxu1  ;;  %v1931_v48 = vld [vmem:[%s2544_s5 + $0x10] sm:$0xff]  }
 0x76d   : > { %v954_v51 = vpop.f32.mrb[18].mxu1  ;;  %v1933_v50 = vld [vmem:[%s2544_s5 + $0x18] sm:$0xff]  }
 0x76e   : > { %v1821_v52 = vpop.f32.mrb[19].mxu1  ;;  %1825 = vmatmul.mubr.msk.bf16.vlgmr.msra.gmra.mrb[24].mxu0 %vm523_vm2, %v957_v49  ;;  %v1932_v49 = vld [vmem:[%s2544_s5 + $0x58] sm:$0xff]   ;;  %v1934_v51 = vld [vmem:[%s2544_s5 + $0x60] sm:$0xff]  }
 0x76f   : > { %1836 = vmatprep.mubr.msk.bf16.mxu0 %vm2062_vm0, %v2061_v0  ;;  %v1913_v0 = vld [vmem:[%s2541_s2 + $0x18] sm:$0xff]   ;;  %v1935_v52 = vld [vmem:[%s2544_s5 + $0x20] sm:$0xff]  }
 0x770   : > { %1841 = vmatpush3.bf16.msra.mxu1 %v1913_v0 }
 0x771   : > { %1716 = vmatprep.subr.bf16.mxu1 %v1926_v45 }
 0x773   : > { %v1054_v53 = vpop.f32.mrb[20].mxu1 }
 0x774   : > { %v1832_v54 = vpop.f32.mrb[21].mxu1  ;;  %v1060_v55 = vsel %vm570_vm4, %v1054_v53, -inf }
 0x775   : > { %1061 = vmax.xlane.f32.xlu0 %v1060_v55  ;;  %v1057_v56 = vpop.f32.mrb[22].mxu1  ;;  %v1937_v54 = vld [vmem:[%s2544_s5 + $0x28] sm:$0xff]  }
 0x776   : > { %v1833_v57 = vpop.f32.mrb[23].mxu1 }
 0x802   : > { %v1062_v58 = vpop.xlane.xlu0 %1061 }
 0x803   : > { %v1063_v59 = vsub.f32 %v1054_v53, %v1062_v58  ;;  %v1936_v53 = vld [vmem:[%s2544_s5 + $0x68] sm:$0xff]   ;;  %v1195_v58 = vsub.s32 1, %v2384_v18 }
 0x805   : > { %v1064_v60 = vmul.f32 1.442695, %v1063_v59  ;;  %v1200_v59 = vsub.s32 2, %v2384_v18 }
 0x807   : > { %1954 = vpow2.f32 %v1064_v60  ;;  %v1196_v60 = vrot.slane %v2390_v20, %v1195_v58  ;;  %v1201_v0 = vrot.slane %v2390_v20, %v1200_v59 }
 0x811   : > { %v1955_v61 = vpop.eup %1954 }
 0x812   : > { %v1066_v62 = vsel %vm570_vm4, %v1955_v61, 0.0 }
 0x813   : > { %1067 = vadd.xlane.f32.xlu1 %v1066_v62 }
 0x824   : > { %1072 = vrot.lane.b32.xlu1 %v2305_v30, %s2065_s23 }
 0x841   : > { %v1003_v63 = vpop.f32.mrb[24].mxu0 }
 0x842   : > { %v1009_v1 = vadd.f32 %v1003_v63, %v842_v27  ;;  %v1826_v2 = vpop.f32.mrb[25].mxu0 }
 0x843   : > { %v1006_v3 = vpop.f32.mrb[26].mxu0 }
 0x844   : > { %v1827_v4 = vpop.f32.mrb[27].mxu0  ;;  %v1938_v3 = vld [vmem:[%s2544_s5 + $0x70] sm:$0xff]  }
 0x845   : > { %v1939_v4 = vld [vmem:[%s2544_s5 + $0x30] sm:$0xff]  }
 0x8a0   : > { %v1068_v5 = vpop.xlane.xlu1 %1067 }
 0x8a1   : > { %1956 = vrcp.f32 %v1068_v5  ;;  %v1940_v5 = vld [vmem:[%s2544_s5 + $0x78] sm:$0xff]  }
 0x8a4   : > { %v1073_v6 = vpop.permute.xlu1 %1072 }
 0x8a5   : > { %v1078_v7 = vsel %vm586_vm3, %v1073_v6, 0  ;;  %v1941_v6 = vld [vmem:[%s2544_s5 + $0x38] sm:$0xff]  }
 0x8a6   : > { %1835 = vmatpush3.bf16.msra.mxu0 %v1078_v7  ;;  %v1212_v7 = vld [vmem:[%s2543_s4] sm:$0x3] }
 0x8a7   : > { %1267 = vmatprep.subr.bf16.mxu0 %v1916_v37 }
 0x8ab   : > { %v1957_v9 = vpop.eup %1956 }
 0x8ac   : > { %v1070_v10 = vmul.f32 %v1957_v9, %v1955_v61  ;;  %v1217_v9 = vrot.slane %v1212_v7, %v1175_v19 }
 0x8ae   : > { %v1071_v11 = vpack.c.bf16 %v1070_v10, %v1070_v10  ;;  %v1221_v10 = vrot.slane %v1212_v7, %v1195_v58 }
 0x8b0   : > { %1837 = vmatmul.mubr.msk.bf16.vlgmr.msra.gmra.mrb[28].mxu0 %vm570_vm4, %v1071_v11 }
 0x8b1   : > { %1268 = vmatpush1.bf16.msra.mxu0 %v1914_v38  ;;  %1299 = vmatprep.mubr.bf16.mxu0 %v2066_v44 }
 0x983   : > { %v1114_v30 = vpop.f32.mrb[28].mxu0 }
 0x984   : > { %v1120_v12 = vpack.c.bf16 %v1114_v30, %v1114_v30  ;;  %v1838_v13 = vpop.f32.mrb[29].mxu0 }
 0x985   : > { %v1117_v14 = vpop.f32.mrb[30].mxu0 }
 0x986   : > { %v1839_v15 = vpop.f32.mrb[31].mxu0  ;;  %1843 = vmatmul.mubr.msk.bf16.vlgmr.msra.gmra.mrb[24].mxu1 %vm523_vm2, %v1120_v12 }
 0x987   : > { %1717 = vmatpush3.bf16.msra.mxu1 %v1927_v46 }
 0x988   : > { %1718 = vmatprep.subr.bf16.mxu1 %v1928_v47 }
 0x98b   : > { %1719 = vmatpush3.bf16.msra.mxu1 %v1929_v16 }
 0x98c   : > { %1720 = vmatprep.subr.bf16.mxu1 %v1930_v22 }
 0x98f   : > { %1721 = vmatpush3.bf16.msra.mxu1 %v1931_v48 }
 0x990   : > { %1722 = vmatprep.subr.bf16.mxu1 %v1932_v49 }
 0x993   : > { %1723 = vmatpush3.bf16.msra.mxu1 %v1933_v50 }
 0x994   : > { %1724 = vmatprep.subr.bf16.mxu1 %v1934_v51 }
 0x997   : > { %1725 = vmatpush3.bf16.msra.mxu1 %v1935_v52 }
 0x998   : > { %1726 = vmatprep.subr.bf16.mxu1 %v1936_v53 }
 0x99b   : > { %1727 = vmatpush3.bf16.msra.mxu1 %v1937_v54 }
 0x99c   : > { %1728 = vmatprep.subr.bf16.mxu1 %v1938_v3 }
 0x99f   : > { %1729 = vmatpush3.bf16.msra.mxu1 %v1939_v4 }
 0x9a0   : > { %1730 = vmatprep.subr.bf16.mxu1 %v1940_v5 }
 0x9a3   : > { %1731 = vmatpush3.bf16.msra.mxu1 %v1941_v6 }
 0xa59   : > { %v1166_v23 = vpop.f32.mrb[24].mxu1 }
 0xa5a   : > { %v1172_v24 = vadd.f32 %v1166_v23, %v1009_v1  ;;  %v1844_v25 = vpop.f32.mrb[25].mxu1 }
 0xa5b   : > { %v1169_v26 = vpop.f32.mrb[26].mxu1  ;;  %v1346_v25 = vsub.s32 3, %v2384_v18 }
 0xa5c   : > { %v1177_v27 = vadd.f32 %v1176_v21, %v1172_v24  ;;  %v1845_v28 = vpop.f32.mrb[27].mxu1 }
 0xa5e   : > { %v1178_v29 = vadd.f32 %v1177_v27, %v2254_v8  ;;  %v1919_v8 = vld [vmem:[%s2542_s3 + $0x14] ss:$8 sps:$4 sm:$0xff]   ;;  %v1347_v27 = vrot.slane %v2390_v20, %v1346_v25 }
 0xa5f   : > { %1269 = vmatprep.subr.bf16.mxu0 %v1919_v8 }
 0xa60   : > { %v1179_v31 = vsel %vm329_vm1, %v1178_v29, 0.0  ;;  %1270 = vmatpush1.bf16.msra.mxu0 %v1917_v39 }
 0xa61   : > { %1180 = vadd.xlane.f32.xlu1 %v1179_v31  ;;  %1271 = vmatprep.subr.bf16.mxu0 %v1922_v40 }
 0xa64   : > { %1272 = vmatpush1.bf16.msra.mxu0 %v1920_v41 }
 0xa65   : > { %1273 = vmatprep.subr.bf16.mxu0 %v1925_v43  ;;  %v1505_v43 = vsub.s32 5, %v2384_v18 }
 0xa67   : > { %v1506_v47 = vrot.slane %v2390_v20, %v1505_v43 }
 0xa68   : > { %1274 = vmatpush1.bf16.msra.mxu0 %v1923_v42  ;;  %v1500_v42 = vsub.s32 4, %v2384_v18 }
 0xa6a   : > { %v1501_v44 = vrot.slane %v2390_v20, %v1500_v42 }
 0xaee   : > { %v1181_v32 = vpop.xlane.xlu1 %1180 }
 0xaef   : > { %v1183_v33 = vmul.f32 0.015625, %v1181_v32 }
 0xaf1   : > { %v1184_v34 = vsub.f32 %v1178_v29, %v1183_v33 }
 0xaf3   : > { %v1185_v35 = vmul.f32 %v1184_v34, %v1184_v34 }
 0xaf5   : > { %v1186_v36 = vsel %vm329_vm1, %v1185_v35, 0.0 }
 0xaf6   : > { %1187 = vadd.xlane.f32.xlu0 %v1186_v36 }
 0xb83   : > { %v1188_v55 = vpop.xlane.xlu0 %1187 }
 0xb84   : > { %v1189_v56 = vmul.f32 0.015625, %v1188_v55 }
 0xb86   : > { %v1190_v57 = vadd.f32 1e-05, %v1189_v56 }
 0xb88   : > { %1958 = vrsqrt.f32 %v1190_v57 }
 0xb92   : > { %v1959_v61 = vpop.eup %1958 }
 0xb93   : > { %v1192_v62 = vmul.f32 %v1959_v61, %v1184_v34 }
 0xb95   : > { %v1197_v63 = vmul.f32 %v1196_v60, %v1192_v62 }
 0xb97   : > { %v1202_v1 = vadd.f32 %v1201_v0, %v1197_v63 }
 0xb99   : > { %v1203_v2 = vpack.c.bf16 %v1202_v1, %v1202_v1 }
 0xb9b   : > { %1656 = vmatmul.mubr.msk.bf16.vlgmr.msra.gmra.mrb[32].mxu0 %vm329_vm1, %v1203_v2 }
 0xc6e   : > { %v1301_v11 = vpop.f32.mrb[32].mxu0 }
 0xc6f   : > { %v1302_v30 = vadd.f32 %v1301_v11, %v1217_v9  ;;  %v1303_v12 = vpop.f32.mrb[33].mxu0 }
 0xc70   : > { %v1304_v13 = vadd.f32 %v1303_v12, %v1221_v10  ;;  %v1305_v14 = vpop.f32.mrb[34].mxu0 }
 0xc71   : > { %v1308_v15 = vmax.f32 %v1302_v30, 0.0  ;;  %v1306_v17 = vpop.f32.mrb[35].mxu0 }
 0xc72   : > { %v1309_v21 = vmax.f32 %v1304_v13, 0.0 }
 0xc73   : > { %v1310_v24 = vpack.c.bf16 %v1308_v15, %v1308_v15 }
 0xc74   : > { %v1311_v23 = vpack.c.bf16 %v1309_v21, %v1309_v21 }
 0xc76   : > { %1476 = vmatprep.mubr.bf16.mxu1 %v1311_v23 }
 0xc77   : > { %1477 = vmatmul.mubr.bf16.vlgmr.msra.gmra.mrb[28].mxu1 %v1310_v24 }
 0xd4a   : > { %v1732_v26 = vpop.f32.mrb[28].mxu1 }
 0xd4b   : > { %v1733_v28 = vpop.f32.mrb[29].mxu1 }
 0xd4c   : > { %v1734_v19 = vadd.f32 %v1733_v28, %v1732_v26  ;;  %v1735_v29 = vpop.f32.mrb[30].mxu1 }
 0xd4d   : > { %v1736_v31 = vpop.f32.mrb[31].mxu1 }
 0xd4e   : > { %v1479_v32 = vadd.f32 %v1734_v19, %v1347_v27 }
 0xd50   : > { %v1484_v33 = vadd.f32 %v1479_v32, %v1202_v1 }
 0xd52   : > { %v1485_v34 = vsel %vm329_vm1, %v1484_v33, 0.0 }
 0xd53   : > { %1486 = vadd.xlane.f32.xlu0 %v1485_v34 }
 0xde0   : > { %v1487_v35 = vpop.xlane.xlu0 %1486 }
 0xde1   : > { %v1488_v36 = vmul.f32 0.015625, %v1487_v35 }
 0xde3   : > { %v1489_v37 = vsub.f32 %v1484_v33, %v1488_v36 }
 0xde5   : > { %v1490_v38 = vmul.f32 %v1489_v37, %v1489_v37 }
 0xde7   : > { %v1491_v8 = vsel %vm329_vm1, %v1490_v38, 0.0 }
 0xde8   : > { %1492 = vadd.xlane.f32.xlu0 %v1491_v8 }
 0xe75   : > { %v1493_v39 = vpop.xlane.xlu0 %1492 }
 0xe76   : > { %v1494_v40 = vmul.f32 0.015625, %v1493_v39 }
 0xe78   : > { %v1495_v41 = vadd.f32 1e-05, %v1494_v40 }
 0xe7a   : > { %1960 = vrsqrt.f32 %v1495_v41 }
 0xe84   : > { %v1961_v45 = vpop.eup %1960 }
 0xe85   : > { %v1497_v46 = vmul.f32 %v1961_v45, %v1489_v37 }
 0xe87   : > { %v1502_v16 = vmul.f32 %v1501_v44, %v1497_v46 }
 0xe89   : > { %v1507_v22 = vadd.f32 %v1506_v47, %v1502_v16 }
 0xe8b   : > { %1508 = vst.msk [vmem:[%s293_s18] sm:$0xff] %vm329_vm1, %v1507_v22 }
 0xe8c   : > { %2005 = shalt.err (!%p2002_p4)
}
 0xe8d   : > { %s2006_s8 = scalar_lea.hbm %s2494_s21, 128  ;;  %s2010_s17 = scalar_lea.hbm %s2546_s7, 256 }
 0xe8e   : > { %p2007_p5 = scmp.ne.s32.totalorder %s2494_s21, %s2006_s8  ;;  %p2011_p0 = scmp.lt.u32.totalorder %s2494_s21, %s2546_s7 }
 0xe8f   : > { %p2012_p1 = scmp.lt.u32.totalorder %s2010_s17, %s2006_s8  ;;  %p2014_p6 = scmp.lt.u32.totalorder %s2006_s8, %s2494_s21 }
 0xe90   : > { %p2008_p8 = pnand %p2007_p5, %p2555_p11 }
 0xe91   : > { %p2013_p3 = por %p2012_p1, %p2011_p0 }
 0xe92   : > { %p2009_p9 = pneg %p2008_p8 }
 0xe93   : > { %p2015_p12 = por %p2014_p6, %p2013_p3 }
 0xe95   : > { %p2016_p13 = pnand %p2015_p12, %p2009_p9 }
 0xe97   : > { %2019 = shalt.err (!%p2016_p13)
}
 0xe98   : > { %1848 = dma.vmem_to_hbm [thread:$0]  (%p2555_p11), %s2496_s15, 128, %s2494_s21, %s1510_s9  }
 0xe99 PF: > { %s1535_s23 = sand.u32 1, %s2046_s24   ;;  %p2556_p7 = scmp.ne.s32.totalorder %s2551_s14, 0 }
 0xe9a   : > { %p2557_p10 = scmp.ge.s32.totalorder %s2058_s27, 2  ;;  %s1536_s19 = scalar_lea.sflag [#allocation4], %s1535_s23 }
 0xe9c   : > { %p1855_p2 = pnand %p2557_p10, %p2556_p7 }
 0xe9e   : > { %2041 = dma.done.wait (!%p1855_p2), %s1536_s19, 128  }
 0xe9f   : > { %2043 = vsyncadd (!%p1855_p2), %s1536_s19, 4294967168  ;;  %p20_p4 = scmp.ge.s32.totalorder %s2133_s30, 4   ;;  %s2558_s24 = smov %s2050_s25 }
 0xea0   : > { %s2559_s25 = smov %s2054_s26  ;;  %s2560_s26 = smov %s2145_s10 }
 0xea1   : > { %s2561_s27 = smov %s2133_s30  ;;  %22 = sbr.rel (!%p20_p4) target bundleno = 5 (0x5), region = 95 }
 0xea8   :  { %1541 = vsyncpa [#allocation3], 1 }
 0xea9   :  { %1543 = vsyncpa [#allocation3 + $0x1], 1 }
 0xeaa   :  { %1544 = vsyncpa [#allocation4], 1 }
 0xeab   :  { %1546 = vsyncpa [#allocation4 + $0x1], 1 }

</bundles_post_ra>
